<compile_context>
chip_gen: v5e
topology: v5e:2x2
jax: 0.10.0
libtpu: 0.0.40
codegen_flags: <defaults>
</compile_context>

<pallas_src>
import functools
from collections import namedtuple

import jax
import jax.numpy as jnp
from jax import lax
from jax.experimental import pallas as pl
from jax.experimental.pallas import tpu as pltpu

Context = namedtuple('Context', ['state', 'enc_outputs', 'attn_pad_mask'])

# ---- module hyper-parameters (small, consistent with the forward) ----------
VOCAB = 32          # vocab_size
EMBED = 16          # embed_size
HIDDEN = 32         # hidden_size
PAD_IDX = 0         # padding_idx


def _encoder_kernel(B, S, V, H,
                    tokcol_ref, table_ref, wrec_ref, bhn_ref,
                    out_ref, hn_ref):
    f32 = jnp.float32
    H2, H4, H6 = 2 * H, 4 * H, 6 * H

    # ---- prologue: embedding + both input projections == ONE one-hot matmul
    lane = lax.broadcasted_iota(jnp.int32, (S * B, V), 1)
    onehot = (lane == tokcol_ref[...]).astype(f32)                    # (S*B, V)
    xall = jnp.dot(onehot, table_ref[...],
                   preferred_element_type=f32)                        # (S*B, 6H)

    wrec = wrec_ref[...]                                              # (2H,6H) bf16
    bhn = jnp.broadcast_to(bhn_ref[...], (B, H2))                     # hoisted
    # forward-direction lanes: first H lanes of each 2H-wide gate block
    fwd_lane = (lax.broadcasted_iota(jnp.int32, (B, H6), 1) % H2) < H

    def sigmoid(v):
        # one tanh on the dependent chain instead of exp + exact divide
        return 0.5 * (jnp.tanh(0.5 * v) + 1.0)

    h = jnp.zeros((B, H2), f32)                  # [h_fwd | h_bwd]
    for i in range(S):                           # static unroll (S is static)
        t_f, t_b = i, S - 1 - i
        xf = xall[t_f * B:(t_f + 1) * B, :]      # fwd direction reads time t_f
        xb = xall[t_b * B:(t_b + 1) * B, :]      # bwd direction reads time t_b
        x_step = jnp.where(fwd_lane, xf, xb)     # off the h critical path

        # one block-diagonal MXU matmul advances BOTH directions
        hproj = jnp.dot(h.astype(jnp.bfloat16), wrec,
                        preferred_element_type=f32)                   # (B, 6H)
        r = sigmoid(x_step[:, 0:H2] + hproj[:, 0:H2])
        z = sigmoid(x_step[:, H2:H4] + hproj[:, H2:H4])
        n = jnp.tanh(x_step[:, H4:H6] + r * (hproj[:, H4:H6] + bhn))
        h = (1.0 - z) * n + z * h

        out_ref[t_f, :, 0:H] = h[:, 0:H]         # fwd hidden at time t_f
        out_ref[t_b, :, H:H2] = h[:, H:H2]       # bwd hidden at time t_b

    # final hidden states (num_directions, B, H)
    hn_ref[0] = h[:, 0:H]
    hn_ref[1] = h[:, H:H2]


def _build_tables(params, H):
    """Wrapper-side parameter folding (layout plumbing, not data-dependent)."""
    def split3(w):
        return w[..., 0:H], w[..., H:2 * H], w[..., 2 * H:3 * H]

    wir_f, wiz_f, win_f = split3(params['w_ih_f'])
    wir_b, wiz_b, win_b = split3(params['w_ih_b'])
    whr_f, whz_f, whn_f = split3(params['w_hh_f'])
    whr_b, whz_b, whn_b = split3(params['w_hh_b'])
    bir_f, biz_f, bin_f = split3(params['b_ih_f'])
    bir_b, biz_b, bin_b = split3(params['b_ih_b'])
    bhr_f, bhz_f, bhn_f = split3(params['b_hh_f'])
    bhr_b, bhz_b, bhn_b = split3(params['b_hh_b'])

    # gate-major / direction-minor 6H layout: [r_f r_b | z_f z_b | n_f n_b]
    w_in = jnp.concatenate([wir_f, wir_b, wiz_f, wiz_b, win_f, win_b], axis=1)
    b_in = jnp.concatenate([bir_f + bhr_f, bir_b + bhr_b,
                            biz_f + bhz_f, biz_b + bhz_b,
                            bin_f, bin_b], axis=1)
    # token -> (embedding @ W_ih + b_ih [+ b_hr/b_hz]) lookup table, (V, 6H)
    table = jnp.dot(params['emb'], w_in) + b_in

    # block-diagonal recurrent weight (2H, 6H): rows 0:H act on h_fwd,
    # rows H:2H act on h_bwd; same gate-major column layout as the table.
    zH = jnp.zeros((H, H), jnp.float32)
    wrec = jnp.concatenate([
        jnp.concatenate([whr_f, zH, whz_f, zH, whn_f, zH], axis=1),
        jnp.concatenate([zH, whr_b, zH, whz_b, zH, whn_b], axis=1),
    ], axis=0)
    bhn = jnp.concatenate([bhn_f, bhn_b], axis=1)                      # (1, 2H)
    # bf16 operands for the per-step MXU matmul (f32 accumulation in-kernel)
    return table.astype(jnp.float32), wrec.astype(jnp.bfloat16), bhn.astype(jnp.float32)


def attention_encoder_forward(x_tokens, params, padding_idx=PAD_IDX):
    """x_tokens: (B, S) int token ids.  Returns (enc_out, Context)."""
    B, S = x_tokens.shape
    V, E = params['emb'].shape
    H = params['w_hh_f'].shape[0]

    tok = x_tokens.astype(jnp.int32)
    pad_mask = tok == padding_idx                    # plain XLA, outside kernel
    # time-major token column (row s*B + b): cheap wrapper-side layout plumbing
    tok_col = tok.T.reshape(S * B, 1)

    table, wrec_bf16, bhn = _build_tables(params, H)

    vmem = pl.BlockSpec(memory_space=pltpu.MemorySpace.VMEM)
    out_tbh, hn = pl.pallas_call(
        functools.partial(_encoder_kernel, B, S, V, H),
        out_shape=(jax.ShapeDtypeStruct((S, B, 2 * H), jnp.float32),  # outputs
                   jax.ShapeDtypeStruct((2, B, H), jnp.float32)),     # h_n
        in_specs=[vmem, vmem, vmem, vmem],
        out_specs=(vmem, vmem),
    )(tok_col, table, wrec_bf16, bhn)

    enc_out = jnp.transpose(out_tbh, (1, 0, 2))      # (B, S, 2H), batch-first
    return enc_out, Context(state=hn, enc_outputs=enc_out, attn_pad_mask=pad_mask)


def init_params(key):
    """PyTorch-style init; linear weights stored transposed as (in, out)."""
    k_emb, k_f, k_b = jax.random.split(key, 3)
    emb = jax.random.normal(k_emb, (VOCAB, EMBED), jnp.float32)
    emb = emb.at[PAD_IDX].set(0.0)        # nn.Embedding zeroes the padding row
    bound = 1.0 / (HIDDEN ** 0.5)

    def gru_dir(k):
        kw1, kw2, kb1, kb2 = jax.random.split(k, 4)
        w_ih = jax.random.uniform(kw1, (EMBED, 3 * HIDDEN), jnp.float32, -bound, bound)
        w_hh = jax.random.uniform(kw2, (HIDDEN, 3 * HIDDEN), jnp.float32, -bound, bound)
        b_ih = jax.random.uniform(kb1, (1, 3 * HIDDEN), jnp.float32, -bound, bound)
        b_hh = jax.random.uniform(kb2, (1, 3 * HIDDEN), jnp.float32, -bound, bound)
        return w_ih, w_hh, b_ih, b_hh

    p = {'emb': emb}
    p['w_ih_f'], p['w_hh_f'], p['b_ih_f'], p['b_hh_f'] = gru_dir(k_f)
    p['w_ih_b'], p['w_hh_b'], p['b_ih_b'], p['b_hh_b'] = gru_dir(k_b)
    return p


def _reference_forward(x_tokens, params):
    """Pure-JAX f32 reference (mirrors PyTorch nn.GRU, batch_first, bidir)."""
    H = params['w_hh_f'].shape[0]
    emb = params['emb'][x_tokens]                         # (B, S, E)
    B, S, _ = emb.shape

    def run_dir(w_ih, w_hh, b_ih, b_hh, reverse):
        h = jnp.zeros((B, H), jnp.float32)
        out = jnp.zeros((B, S, H), jnp.float32)
        order = list(reversed(range(S))) if reverse else list(range(S))
        for t in order:
            gi = emb[:, t] @ w_ih + b_ih
            gh = h @ w_hh + b_hh
            r = jax.nn.sigmoid(gi[:, :H] + gh[:, :H])
            z = jax.nn.sigmoid(gi[:, H:2 * H] + gh[:, H:2 * H])
            n = jnp.tanh(gi[:, 2 * H:] + r * gh[:, 2 * H:])
            h = (1.0 - z) * n + z * h
            out = out.at[:, t].set(h)
        return out, h

    out_f, hf = run_dir(params['w_ih_f'], params['w_hh_f'],
                        params['b_ih_f'], params['b_hh_f'], False)
    out_b, hb = run_dir(params['w_ih_b'], params['w_hh_b'],
                        params['b_ih_b'], params['b_hh_b'], True)
    return jnp.concatenate([out_f, out_b], axis=-1), jnp.stack([hf, hb])


if __name__ == "__main__":
    key = jax.random.PRNGKey(0)
    kx, kp = jax.random.split(key)

    B, S = 2, 8
    x = jax.random.randint(kx, (B, S), 1, VOCAB, dtype=jnp.int32)
    x = x.at[:, S - 2:].set(PAD_IDX)          # trailing padding exercises the mask

    params = init_params(kp)
    enc_out, ctx = attention_encoder_forward(x, params)
    jax.block_until_ready((enc_out, ctx.state, ctx.enc_outputs, ctx.attn_pad_mask))

    assert enc_out.shape == (B, S, 2 * HIDDEN)
    assert ctx.state.shape == (2, B, HIDDEN)
    assert ctx.enc_outputs.shape == (B, S, 2 * HIDDEN)
    assert ctx.attn_pad_mask.shape == (B, S) and ctx.attn_pad_mask.dtype == jnp.bool_
    assert bool(jnp.all(ctx.attn_pad_mask == (x == PAD_IDX)))

    # validate the bf16 recurrent-matmul approximation against an f32 reference
    ref_out, ref_hn = _reference_forward(x, params)
    assert float(jnp.max(jnp.abs(enc_out - ref_out))) < 5e-2
    assert float(jnp.max(jnp.abs(ctx.state - ref_hn))) < 5e-2

    print("KERNEL_OK")
</pallas_src>

<mosaic_0001>
module attributes {stable_mosaic.version = 11 : i64} {
  func.func @_encoder_kernel(%arg0: memref<16x1xi32, #tpu.memory_space<vmem>>, %arg1: memref<32x192xf32, #tpu.memory_space<vmem>>, %arg2: memref<64x192xbf16, #tpu.memory_space<vmem>>, %arg3: memref<1x64xf32, #tpu.memory_space<vmem>>, %arg4: memref<8x2x64xf32, #tpu.memory_space<vmem>>, %arg5: memref<2x2x32xf32, #tpu.memory_space<vmem>>) attributes {dimension_semantics = [], scalar_prefetch = 0 : i64, scratch_operands = 0 : i64, tpu.core_type = #tpu.core_type<tc>} {
    %0 = tpu.iota {dimensions = array<i32: 1>} : vector<16x32xi32>
    %c0 = arith.constant 0 : index
    %c0_0 = arith.constant 0 : index
    %1 = vector.load %arg0[%c0, %c0_0] : memref<16x1xi32, #tpu.memory_space<vmem>>, vector<16x1xi32>
    %2 = vector.broadcast %1 : vector<16x1xi32> to vector<16x32xi32>
    %3 = arith.cmpi eq, %0, %2 : vector<16x32xi32>
    %4 = arith.extui %3 : vector<16x32xi1> to vector<16x32xi32>
    %5 = arith.sitofp %4 : vector<16x32xi32> to vector<16x32xf32>
    %c0_1 = arith.constant 0 : index
    %c0_2 = arith.constant 0 : index
    %6 = vector.load %arg1[%c0_1, %c0_2] : memref<32x192xf32, #tpu.memory_space<vmem>>, vector<32x192xf32>
    %cst = arith.constant dense<0.000000e+00> : vector<16x192xf32>
    %7 = tpu.matmul %5, %6, %cst {dimension_numbers = #tpu.dot_dimension_numbers<[1], [0], [0], [1], [0, 0, 1, 1], [], []>} : vector<16x32xf32>, vector<32x192xf32>, vector<16x192xf32> -> vector<16x192xf32>
    %c0_3 = arith.constant 0 : index
    %c0_4 = arith.constant 0 : index
    %8 = vector.load %arg2[%c0_3, %c0_4] : memref<64x192xbf16, #tpu.memory_space<vmem>>, vector<64x192xbf16>
    %c0_5 = arith.constant 0 : index
    %c0_6 = arith.constant 0 : index
    %9 = vector.load %arg3[%c0_5, %c0_6] : memref<1x64xf32, #tpu.memory_space<vmem>>, vector<1x64xf32>
    %10 = vector.shape_cast %9 : vector<1x64xf32> to vector<1x64xf32>
    %11 = vector.broadcast %10 : vector<1x64xf32> to vector<2x64xf32>
    %12 = tpu.iota {dimensions = array<i32: 1>} : vector<2x192xi32>
    %c64_i32 = arith.constant 64 : i32
    %c0_i32 = arith.constant 0 : i32
    %13 = arith.cmpi eq, %c64_i32, %c0_i32 : i32
    %c1_i32 = arith.constant 1 : i32
    %14 = arith.select %13, %c1_i32, %c64_i32 : i32
    %15 = vector.broadcast %14 : i32 to vector<2x192xi32>
    %16 = arith.remsi %12, %15 : vector<2x192xi32>
    %c0_i32_7 = arith.constant 0 : i32
    %17 = vector.broadcast %c0_i32_7 : i32 to vector<2x192xi32>
    %18 = arith.cmpi ne, %16, %17 : vector<2x192xi32>
    %c0_i32_8 = arith.constant 0 : i32
    %19 = vector.broadcast %c0_i32_8 : i32 to vector<2x192xi32>
    %20 = arith.cmpi slt, %16, %19 : vector<2x192xi32>
    %c0_i32_9 = arith.constant 0 : i32
    %21 = arith.cmpi slt, %14, %c0_i32_9 : i32
    %22 = vector.broadcast %21 : i1 to vector<2x192xi1>
    %23 = vector.broadcast %22 : vector<2x192xi1> to vector<2x192xi1>
    %24 = arith.xori %20, %23 : vector<2x192xi1>
    %25 = arith.andi %24, %18 : vector<2x192xi1>
    %26 = vector.broadcast %14 : i32 to vector<2x192xi32>
    %27 = arith.addi %16, %26 : vector<2x192xi32>
    %28 = arith.select %25, %27, %16 : vector<2x192xi1>, vector<2x192xi32>
    %c32_i32 = arith.constant 32 : i32
    %29 = vector.broadcast %c32_i32 : i32 to vector<2x192xi32>
    %30 = arith.cmpi slt, %28, %29 : vector<2x192xi32>
    %cst_10 = arith.constant 0.000000e+00 : f32
    %31 = vector.broadcast %cst_10 : f32 to vector<2x64xf32>
    %32 = vector.extract_strided_slice %7 {offsets = [0, 0], sizes = [2, 192], strides = [1, 1]} : vector<16x192xf32> to vector<2x192xf32>
    %33 = vector.extract_strided_slice %7 {offsets = [14, 0], sizes = [2, 192], strides = [1, 1]} : vector<16x192xf32> to vector<2x192xf32>
    %34 = arith.select %30, %32, %33 : vector<2x192xi1>, vector<2x192xf32>
    %35 = arith.truncf %31 : vector<2x64xf32> to vector<2x64xbf16>
    %cst_11 = arith.constant dense<0.000000e+00> : vector<2x192xf32>
    %36 = tpu.matmul %35, %8, %cst_11 {dimension_numbers = #tpu.dot_dimension_numbers<[1], [0], [0], [1], [0, 0, 1, 1], [], []>} : vector<2x64xbf16>, vector<64x192xbf16>, vector<2x192xf32> -> vector<2x192xf32>
    %37 = vector.extract_strided_slice %34 {offsets = [0, 0], sizes = [2, 64], strides = [1, 1]} : vector<2x192xf32> to vector<2x64xf32>
    %38 = vector.extract_strided_slice %36 {offsets = [0, 0], sizes = [2, 64], strides = [1, 1]} : vector<2x192xf32> to vector<2x64xf32>
    %39 = arith.addf %37, %38 : vector<2x64xf32>
    %cst_12 = arith.constant 5.000000e-01 : f32
    %40 = vector.broadcast %cst_12 : f32 to vector<2x64xf32>
    %41 = arith.mulf %40, %39 : vector<2x64xf32>
    %42 = math.tanh %41 : vector<2x64xf32>
    %cst_13 = arith.constant 1.000000e+00 : f32
    %43 = vector.broadcast %cst_13 : f32 to vector<2x64xf32>
    %44 = arith.addf %42, %43 : vector<2x64xf32>
    %cst_14 = arith.constant 5.000000e-01 : f32
    %45 = vector.broadcast %cst_14 : f32 to vector<2x64xf32>
    %46 = arith.mulf %45, %44 : vector<2x64xf32>
    %47 = vector.extract_strided_slice %34 {offsets = [0, 64], sizes = [2, 64], strides = [1, 1]} : vector<2x192xf32> to vector<2x64xf32>
    %48 = vector.extract_strided_slice %36 {offsets = [0, 64], sizes = [2, 64], strides = [1, 1]} : vector<2x192xf32> to vector<2x64xf32>
    %49 = arith.addf %47, %48 : vector<2x64xf32>
    %cst_15 = arith.constant 5.000000e-01 : f32
    %50 = vector.broadcast %cst_15 : f32 to vector<2x64xf32>
    %51 = arith.mulf %50, %49 : vector<2x64xf32>
    %52 = math.tanh %51 : vector<2x64xf32>
    %cst_16 = arith.constant 1.000000e+00 : f32
    %53 = vector.broadcast %cst_16 : f32 to vector<2x64xf32>
    %54 = arith.addf %52, %53 : vector<2x64xf32>
    %cst_17 = arith.constant 5.000000e-01 : f32
    %55 = vector.broadcast %cst_17 : f32 to vector<2x64xf32>
    %56 = arith.mulf %55, %54 : vector<2x64xf32>
    %57 = vector.extract_strided_slice %34 {offsets = [0, 128], sizes = [2, 64], strides = [1, 1]} : vector<2x192xf32> to vector<2x64xf32>
    %58 = vector.extract_strided_slice %36 {offsets = [0, 128], sizes = [2, 64], strides = [1, 1]} : vector<2x192xf32> to vector<2x64xf32>
    %59 = arith.addf %58, %11 : vector<2x64xf32>
    %60 = arith.mulf %46, %59 : vector<2x64xf32>
    %61 = arith.addf %57, %60 : vector<2x64xf32>
    %62 = math.tanh %61 : vector<2x64xf32>
    %cst_18 = arith.constant 1.000000e+00 : f32
    %63 = vector.broadcast %cst_18 : f32 to vector<2x64xf32>
    %64 = arith.subf %63, %56 : vector<2x64xf32>
    %65 = arith.mulf %64, %62 : vector<2x64xf32>
    %66 = arith.mulf %56, %31 : vector<2x64xf32>
    %67 = arith.addf %65, %66 : vector<2x64xf32>
    %68 = vector.extract_strided_slice %67 {offsets = [0, 0], sizes = [2, 32], strides = [1, 1]} : vector<2x64xf32> to vector<2x32xf32>
    %c0_19 = arith.constant 0 : index
    %c0_20 = arith.constant 0 : index
    %c0_21 = arith.constant 0 : index
    %69 = vector.load %arg4[%c0_19, %c0_20, %c0_21] : memref<8x2x64xf32, #tpu.memory_space<vmem>>, vector<1x2x32xf32>
    %70 = vector.shape_cast %69 : vector<1x2x32xf32> to vector<2x32xf32>
    %71 = vector.shape_cast %68 : vector<2x32xf32> to vector<1x2x32xf32>
    tpu.vector_store %arg4[%c0_19, %c0_20, %c0_21], %71 {strides = array<i32>} : memref<8x2x64xf32, #tpu.memory_space<vmem>>, vector<1x2x32xf32>,
    %72 = vector.extract_strided_slice %67 {offsets = [0, 32], sizes = [2, 32], strides = [1, 1]} : vector<2x64xf32> to vector<2x32xf32>
    %c7 = arith.constant 7 : index
    %c0_22 = arith.constant 0 : index
    %c32 = arith.constant 32 : index
    %73 = vector.load %arg4[%c7, %c0_22, %c32] : memref<8x2x64xf32, #tpu.memory_space<vmem>>, vector<1x2x32xf32>
    %74 = vector.shape_cast %73 : vector<1x2x32xf32> to vector<2x32xf32>
    %75 = vector.shape_cast %72 : vector<2x32xf32> to vector<1x2x32xf32>
    tpu.vector_store %arg4[%c7, %c0_22, %c32], %75 {strides = array<i32>} : memref<8x2x64xf32, #tpu.memory_space<vmem>>, vector<1x2x32xf32>,
    %76 = vector.extract_strided_slice %7 {offsets = [2, 0], sizes = [2, 192], strides = [1, 1]} : vector<16x192xf32> to vector<2x192xf32>
    %77 = vector.extract_strided_slice %7 {offsets = [12, 0], sizes = [2, 192], strides = [1, 1]} : vector<16x192xf32> to vector<2x192xf32>
    %78 = arith.select %30, %76, %77 : vector<2x192xi1>, vector<2x192xf32>
    %79 = arith.truncf %67 : vector<2x64xf32> to vector<2x64xbf16>
    %cst_23 = arith.constant dense<0.000000e+00> : vector<2x192xf32>
    %80 = tpu.matmul %79, %8, %cst_23 {dimension_numbers = #tpu.dot_dimension_numbers<[1], [0], [0], [1], [0, 0, 1, 1], [], []>} : vector<2x64xbf16>, vector<64x192xbf16>, vector<2x192xf32> -> vector<2x192xf32>
    %81 = vector.extract_strided_slice %78 {offsets = [0, 0], sizes = [2, 64], strides = [1, 1]} : vector<2x192xf32> to vector<2x64xf32>
    %82 = vector.extract_strided_slice %80 {offsets = [0, 0], sizes = [2, 64], strides = [1, 1]} : vector<2x192xf32> to vector<2x64xf32>
    %83 = arith.addf %81, %82 : vector<2x64xf32>
    %cst_24 = arith.constant 5.000000e-01 : f32
    %84 = vector.broadcast %cst_24 : f32 to vector<2x64xf32>
    %85 = arith.mulf %84, %83 : vector<2x64xf32>
    %86 = math.tanh %85 : vector<2x64xf32>
    %cst_25 = arith.constant 1.000000e+00 : f32
    %87 = vector.broadcast %cst_25 : f32 to vector<2x64xf32>
    %88 = arith.addf %86, %87 : vector<2x64xf32>
    %cst_26 = arith.constant 5.000000e-01 : f32
    %89 = vector.broadcast %cst_26 : f32 to vector<2x64xf32>
    %90 = arith.mulf %89, %88 : vector<2x64xf32>
    %91 = vector.extract_strided_slice %78 {offsets = [0, 64], sizes = [2, 64], strides = [1, 1]} : vector<2x192xf32> to vector<2x64xf32>
    %92 = vector.extract_strided_slice %80 {offsets = [0, 64], sizes = [2, 64], strides = [1, 1]} : vector<2x192xf32> to vector<2x64xf32>
    %93 = arith.addf %91, %92 : vector<2x64xf32>
    %cst_27 = arith.constant 5.000000e-01 : f32
    %94 = vector.broadcast %cst_27 : f32 to vector<2x64xf32>
    %95 = arith.mulf %94, %93 : vector<2x64xf32>
    %96 = math.tanh %95 : vector<2x64xf32>
    %cst_28 = arith.constant 1.000000e+00 : f32
    %97 = vector.broadcast %cst_28 : f32 to vector<2x64xf32>
    %98 = arith.addf %96, %97 : vector<2x64xf32>
    %cst_29 = arith.constant 5.000000e-01 : f32
    %99 = vector.broadcast %cst_29 : f32 to vector<2x64xf32>
    %100 = arith.mulf %99, %98 : vector<2x64xf32>
    %101 = vector.extract_strided_slice %78 {offsets = [0, 128], sizes = [2, 64], strides = [1, 1]} : vector<2x192xf32> to vector<2x64xf32>
    %102 = vector.extract_strided_slice %80 {offsets = [0, 128], sizes = [2, 64], strides = [1, 1]} : vector<2x192xf32> to vector<2x64xf32>
    %103 = arith.addf %102, %11 : vector<2x64xf32>
    %104 = arith.mulf %90, %103 : vector<2x64xf32>
    %105 = arith.addf %101, %104 : vector<2x64xf32>
    %106 = math.tanh %105 : vector<2x64xf32>
    %cst_30 = arith.constant 1.000000e+00 : f32
    %107 = vector.broadcast %cst_30 : f32 to vector<2x64xf32>
    %108 = arith.subf %107, %100 : vector<2x64xf32>
    %109 = arith.mulf %108, %106 : vector<2x64xf32>
    %110 = arith.mulf %100, %67 : vector<2x64xf32>
    %111 = arith.addf %109, %110 : vector<2x64xf32>
    %112 = vector.extract_strided_slice %111 {offsets = [0, 0], sizes = [2, 32], strides = [1, 1]} : vector<2x64xf32> to vector<2x32xf32>
    %c1 = arith.constant 1 : index
    %c0_31 = arith.constant 0 : index
    %c0_32 = arith.constant 0 : index
    %113 = vector.load %arg4[%c1, %c0_31, %c0_32] : memref<8x2x64xf32, #tpu.memory_space<vmem>>, vector<1x2x32xf32>
    %114 = vector.shape_cast %113 : vector<1x2x32xf32> to vector<2x32xf32>
    %115 = vector.shape_cast %112 : vector<2x32xf32> to vector<1x2x32xf32>
    tpu.vector_store %arg4[%c1, %c0_31, %c0_32], %115 {strides = array<i32>} : memref<8x2x64xf32, #tpu.memory_space<vmem>>, vector<1x2x32xf32>,
    %116 = vector.extract_strided_slice %111 {offsets = [0, 32], sizes = [2, 32], strides = [1, 1]} : vector<2x64xf32> to vector<2x32xf32>
    %c6 = arith.constant 6 : index
    %c0_33 = arith.constant 0 : index
    %c32_34 = arith.constant 32 : index
    %117 = vector.load %arg4[%c6, %c0_33, %c32_34] : memref<8x2x64xf32, #tpu.memory_space<vmem>>, vector<1x2x32xf32>
    %118 = vector.shape_cast %117 : vector<1x2x32xf32> to vector<2x32xf32>
    %119 = vector.shape_cast %116 : vector<2x32xf32> to vector<1x2x32xf32>
    tpu.vector_store %arg4[%c6, %c0_33, %c32_34], %119 {strides = array<i32>} : memref<8x2x64xf32, #tpu.memory_space<vmem>>, vector<1x2x32xf32>,
    %120 = vector.extract_strided_slice %7 {offsets = [4, 0], sizes = [2, 192], strides = [1, 1]} : vector<16x192xf32> to vector<2x192xf32>
    %121 = vector.extract_strided_slice %7 {offsets = [10, 0], sizes = [2, 192], strides = [1, 1]} : vector<16x192xf32> to vector<2x192xf32>
    %122 = arith.select %30, %120, %121 : vector<2x192xi1>, vector<2x192xf32>
    %123 = arith.truncf %111 : vector<2x64xf32> to vector<2x64xbf16>
    %cst_35 = arith.constant dense<0.000000e+00> : vector<2x192xf32>
    %124 = tpu.matmul %123, %8, %cst_35 {dimension_numbers = #tpu.dot_dimension_numbers<[1], [0], [0], [1], [0, 0, 1, 1], [], []>} : vector<2x64xbf16>, vector<64x192xbf16>, vector<2x192xf32> -> vector<2x192xf32>
    %125 = vector.extract_strided_slice %122 {offsets = [0, 0], sizes = [2, 64], strides = [1, 1]} : vector<2x192xf32> to vector<2x64xf32>
    %126 = vector.extract_strided_slice %124 {offsets = [0, 0], sizes = [2, 64], strides = [1, 1]} : vector<2x192xf32> to vector<2x64xf32>
    %127 = arith.addf %125, %126 : vector<2x64xf32>
    %cst_36 = arith.constant 5.000000e-01 : f32
    %128 = vector.broadcast %cst_36 : f32 to vector<2x64xf32>
    %129 = arith.mulf %128, %127 : vector<2x64xf32>
    %130 = math.tanh %129 : vector<2x64xf32>
    %cst_37 = arith.constant 1.000000e+00 : f32
    %131 = vector.broadcast %cst_37 : f32 to vector<2x64xf32>
    %132 = arith.addf %130, %131 : vector<2x64xf32>
    %cst_38 = arith.constant 5.000000e-01 : f32
    %133 = vector.broadcast %cst_38 : f32 to vector<2x64xf32>
    %134 = arith.mulf %133, %132 : vector<2x64xf32>
    %135 = vector.extract_strided_slice %122 {offsets = [0, 64], sizes = [2, 64], strides = [1, 1]} : vector<2x192xf32> to vector<2x64xf32>
    %136 = vector.extract_strided_slice %124 {offsets = [0, 64], sizes = [2, 64], strides = [1, 1]} : vector<2x192xf32> to vector<2x64xf32>
    %137 = arith.addf %135, %136 : vector<2x64xf32>
    %cst_39 = arith.constant 5.000000e-01 : f32
    %138 = vector.broadcast %cst_39 : f32 to vector<2x64xf32>
    %139 = arith.mulf %138, %137 : vector<2x64xf32>
    %140 = math.tanh %139 : vector<2x64xf32>
    %cst_40 = arith.constant 1.000000e+00 : f32
    %141 = vector.broadcast %cst_40 : f32 to vector<2x64xf32>
    %142 = arith.addf %140, %141 : vector<2x64xf32>
    %cst_41 = arith.constant 5.000000e-01 : f32
    %143 = vector.broadcast %cst_41 : f32 to vector<2x64xf32>
    %144 = arith.mulf %143, %142 : vector<2x64xf32>
    %145 = vector.extract_strided_slice %122 {offsets = [0, 128], sizes = [2, 64], strides = [1, 1]} : vector<2x192xf32> to vector<2x64xf32>
    %146 = vector.extract_strided_slice %124 {offsets = [0, 128], sizes = [2, 64], strides = [1, 1]} : vector<2x192xf32> to vector<2x64xf32>
    %147 = arith.addf %146, %11 : vector<2x64xf32>
    %148 = arith.mulf %134, %147 : vector<2x64xf32>
    %149 = arith.addf %145, %148 : vector<2x64xf32>
    %150 = math.tanh %149 : vector<2x64xf32>
    %cst_42 = arith.constant 1.000000e+00 : f32
    %151 = vector.broadcast %cst_42 : f32 to vector<2x64xf32>
    %152 = arith.subf %151, %144 : vector<2x64xf32>
    %153 = arith.mulf %152, %150 : vector<2x64xf32>
    %154 = arith.mulf %144, %111 : vector<2x64xf32>
    %155 = arith.addf %153, %154 : vector<2x64xf32>
    %156 = vector.extract_strided_slice %155 {offsets = [0, 0], sizes = [2, 32], strides = [1, 1]} : vector<2x64xf32> to vector<2x32xf32>
    %c2 = arith.constant 2 : index
    %c0_43 = arith.constant 0 : index
    %c0_44 = arith.constant 0 : index
    %157 = vector.load %arg4[%c2, %c0_43, %c0_44] : memref<8x2x64xf32, #tpu.memory_space<vmem>>, vector<1x2x32xf32>
    %158 = vector.shape_cast %157 : vector<1x2x32xf32> to vector<2x32xf32>
    %159 = vector.shape_cast %156 : vector<2x32xf32> to vector<1x2x32xf32>
    tpu.vector_store %arg4[%c2, %c0_43, %c0_44], %159 {strides = array<i32>} : memref<8x2x64xf32, #tpu.memory_space<vmem>>, vector<1x2x32xf32>,
    %160 = vector.extract_strided_slice %155 {offsets = [0, 32], sizes = [2, 32], strides = [1, 1]} : vector<2x64xf32> to vector<2x32xf32>
    %c5 = arith.constant 5 : index
    %c0_45 = arith.constant 0 : index
    %c32_46 = arith.constant 32 : index
    %161 = vector.load %arg4[%c5, %c0_45, %c32_46] : memref<8x2x64xf32, #tpu.memory_space<vmem>>, vector<1x2x32xf32>
    %162 = vector.shape_cast %161 : vector<1x2x32xf32> to vector<2x32xf32>
    %163 = vector.shape_cast %160 : vector<2x32xf32> to vector<1x2x32xf32>
    tpu.vector_store %arg4[%c5, %c0_45, %c32_46], %163 {strides = array<i32>} : memref<8x2x64xf32, #tpu.memory_space<vmem>>, vector<1x2x32xf32>,
    %164 = vector.extract_strided_slice %7 {offsets = [6, 0], sizes = [2, 192], strides = [1, 1]} : vector<16x192xf32> to vector<2x192xf32>
    %165 = vector.extract_strided_slice %7 {offsets = [8, 0], sizes = [2, 192], strides = [1, 1]} : vector<16x192xf32> to vector<2x192xf32>
    %166 = arith.select %30, %164, %165 : vector<2x192xi1>, vector<2x192xf32>
    %167 = arith.truncf %155 : vector<2x64xf32> to vector<2x64xbf16>
    %cst_47 = arith.constant dense<0.000000e+00> : vector<2x192xf32>
    %168 = tpu.matmul %167, %8, %cst_47 {dimension_numbers = #tpu.dot_dimension_numbers<[1], [0], [0], [1], [0, 0, 1, 1], [], []>} : vector<2x64xbf16>, vector<64x192xbf16>, vector<2x192xf32> -> vector<2x192xf32>
    %169 = vector.extract_strided_slice %166 {offsets = [0, 0], sizes = [2, 64], strides = [1, 1]} : vector<2x192xf32> to vector<2x64xf32>
    %170 = vector.extract_strided_slice %168 {offsets = [0, 0], sizes = [2, 64], strides = [1, 1]} : vector<2x192xf32> to vector<2x64xf32>
    %171 = arith.addf %169, %170 : vector<2x64xf32>
    %cst_48 = arith.constant 5.000000e-01 : f32
    %172 = vector.broadcast %cst_48 : f32 to vector<2x64xf32>
    %173 = arith.mulf %172, %171 : vector<2x64xf32>
    %174 = math.tanh %173 : vector<2x64xf32>
    %cst_49 = arith.constant 1.000000e+00 : f32
    %175 = vector.broadcast %cst_49 : f32 to vector<2x64xf32>
    %176 = arith.addf %174, %175 : vector<2x64xf32>
    %cst_50 = arith.constant 5.000000e-01 : f32
    %177 = vector.broadcast %cst_50 : f32 to vector<2x64xf32>
    %178 = arith.mulf %177, %176 : vector<2x64xf32>
    %179 = vector.extract_strided_slice %166 {offsets = [0, 64], sizes = [2, 64], strides = [1, 1]} : vector<2x192xf32> to vector<2x64xf32>
    %180 = vector.extract_strided_slice %168 {offsets = [0, 64], sizes = [2, 64], strides = [1, 1]} : vector<2x192xf32> to vector<2x64xf32>
    %181 = arith.addf %179, %180 : vector<2x64xf32>
    %cst_51 = arith.constant 5.000000e-01 : f32
    %182 = vector.broadcast %cst_51 : f32 to vector<2x64xf32>
    %183 = arith.mulf %182, %181 : vector<2x64xf32>
    %184 = math.tanh %183 : vector<2x64xf32>
    %cst_52 = arith.constant 1.000000e+00 : f32
    %185 = vector.broadcast %cst_52 : f32 to vector<2x64xf32>
    %186 = arith.addf %184, %185 : vector<2x64xf32>
    %cst_53 = arith.constant 5.000000e-01 : f32
    %187 = vector.broadcast %cst_53 : f32 to vector<2x64xf32>
    %188 = arith.mulf %187, %186 : vector<2x64xf32>
    %189 = vector.extract_strided_slice %166 {offsets = [0, 128], sizes = [2, 64], strides = [1, 1]} : vector<2x192xf32> to vector<2x64xf32>
    %190 = vector.extract_strided_slice %168 {offsets = [0, 128], sizes = [2, 64], strides = [1, 1]} : vector<2x192xf32> to vector<2x64xf32>
    %191 = arith.addf %190, %11 : vector<2x64xf32>
    %192 = arith.mulf %178, %191 : vector<2x64xf32>
    %193 = arith.addf %189, %192 : vector<2x64xf32>
    %194 = math.tanh %193 : vector<2x64xf32>
    %cst_54 = arith.constant 1.000000e+00 : f32
    %195 = vector.broadcast %cst_54 : f32 to vector<2x64xf32>
    %196 = arith.subf %195, %188 : vector<2x64xf32>
    %197 = arith.mulf %196, %194 : vector<2x64xf32>
    %198 = arith.mulf %188, %155 : vector<2x64xf32>
    %199 = arith.addf %197, %198 : vector<2x64xf32>
    %200 = vector.extract_strided_slice %199 {offsets = [0, 0], sizes = [2, 32], strides = [1, 1]} : vector<2x64xf32> to vector<2x32xf32>
    %c3 = arith.constant 3 : index
    %c0_55 = arith.constant 0 : index
    %c0_56 = arith.constant 0 : index
    %201 = vector.load %arg4[%c3, %c0_55, %c0_56] : memref<8x2x64xf32, #tpu.memory_space<vmem>>, vector<1x2x32xf32>
    %202 = vector.shape_cast %201 : vector<1x2x32xf32> to vector<2x32xf32>
    %203 = vector.shape_cast %200 : vector<2x32xf32> to vector<1x2x32xf32>
    tpu.vector_store %arg4[%c3, %c0_55, %c0_56], %203 {strides = array<i32>} : memref<8x2x64xf32, #tpu.memory_space<vmem>>, vector<1x2x32xf32>,
    %204 = vector.extract_strided_slice %199 {offsets = [0, 32], sizes = [2, 32], strides = [1, 1]} : vector<2x64xf32> to vector<2x32xf32>
    %c4 = arith.constant 4 : index
    %c0_57 = arith.constant 0 : index
    %c32_58 = arith.constant 32 : index
    %205 = vector.load %arg4[%c4, %c0_57, %c32_58] : memref<8x2x64xf32, #tpu.memory_space<vmem>>, vector<1x2x32xf32>
    %206 = vector.shape_cast %205 : vector<1x2x32xf32> to vector<2x32xf32>
    %207 = vector.shape_cast %204 : vector<2x32xf32> to vector<1x2x32xf32>
    tpu.vector_store %arg4[%c4, %c0_57, %c32_58], %207 {strides = array<i32>} : memref<8x2x64xf32, #tpu.memory_space<vmem>>, vector<1x2x32xf32>,
    %208 = vector.extract_strided_slice %7 {offsets = [8, 0], sizes = [2, 192], strides = [1, 1]} : vector<16x192xf32> to vector<2x192xf32>
    %209 = vector.extract_strided_slice %7 {offsets = [6, 0], sizes = [2, 192], strides = [1, 1]} : vector<16x192xf32> to vector<2x192xf32>
    %210 = arith.select %30, %208, %209 : vector<2x192xi1>, vector<2x192xf32>
    %211 = arith.truncf %199 : vector<2x64xf32> to vector<2x64xbf16>
    %cst_59 = arith.constant dense<0.000000e+00> : vector<2x192xf32>
    %212 = tpu.matmul %211, %8, %cst_59 {dimension_numbers = #tpu.dot_dimension_numbers<[1], [0], [0], [1], [0, 0, 1, 1], [], []>} : vector<2x64xbf16>, vector<64x192xbf16>, vector<2x192xf32> -> vector<2x192xf32>
    %213 = vector.extract_strided_slice %210 {offsets = [0, 0], sizes = [2, 64], strides = [1, 1]} : vector<2x192xf32> to vector<2x64xf32>
    %214 = vector.extract_strided_slice %212 {offsets = [0, 0], sizes = [2, 64], strides = [1, 1]} : vector<2x192xf32> to vector<2x64xf32>
    %215 = arith.addf %213, %214 : vector<2x64xf32>
    %cst_60 = arith.constant 5.000000e-01 : f32
    %216 = vector.broadcast %cst_60 : f32 to vector<2x64xf32>
    %217 = arith.mulf %216, %215 : vector<2x64xf32>
    %218 = math.tanh %217 : vector<2x64xf32>
    %cst_61 = arith.constant 1.000000e+00 : f32
    %219 = vector.broadcast %cst_61 : f32 to vector<2x64xf32>
    %220 = arith.addf %218, %219 : vector<2x64xf32>
    %cst_62 = arith.constant 5.000000e-01 : f32
    %221 = vector.broadcast %cst_62 : f32 to vector<2x64xf32>
    %222 = arith.mulf %221, %220 : vector<2x64xf32>
    %223 = vector.extract_strided_slice %210 {offsets = [0, 64], sizes = [2, 64], strides = [1, 1]} : vector<2x192xf32> to vector<2x64xf32>
    %224 = vector.extract_strided_slice %212 {offsets = [0, 64], sizes = [2, 64], strides = [1, 1]} : vector<2x192xf32> to vector<2x64xf32>
    %225 = arith.addf %223, %224 : vector<2x64xf32>
    %cst_63 = arith.constant 5.000000e-01 : f32
    %226 = vector.broadcast %cst_63 : f32 to vector<2x64xf32>
    %227 = arith.mulf %226, %225 : vector<2x64xf32>
    %228 = math.tanh %227 : vector<2x64xf32>
    %cst_64 = arith.constant 1.000000e+00 : f32
    %229 = vector.broadcast %cst_64 : f32 to vector<2x64xf32>
    %230 = arith.addf %228, %229 : vector<2x64xf32>
    %cst_65 = arith.constant 5.000000e-01 : f32
    %231 = vector.broadcast %cst_65 : f32 to vector<2x64xf32>
    %232 = arith.mulf %231, %230 : vector<2x64xf32>
    %233 = vector.extract_strided_slice %210 {offsets = [0, 128], sizes = [2, 64], strides = [1, 1]} : vector<2x192xf32> to vector<2x64xf32>
    %234 = vector.extract_strided_slice %212 {offsets = [0, 128], sizes = [2, 64], strides = [1, 1]} : vector<2x192xf32> to vector<2x64xf32>
    %235 = arith.addf %234, %11 : vector<2x64xf32>
    %236 = arith.mulf %222, %235 : vector<2x64xf32>
    %237 = arith.addf %233, %236 : vector<2x64xf32>
    %238 = math.tanh %237 : vector<2x64xf32>
    %cst_66 = arith.constant 1.000000e+00 : f32
    %239 = vector.broadcast %cst_66 : f32 to vector<2x64xf32>
    %240 = arith.subf %239, %232 : vector<2x64xf32>
    %241 = arith.mulf %240, %238 : vector<2x64xf32>
    %242 = arith.mulf %232, %199 : vector<2x64xf32>
    %243 = arith.addf %241, %242 : vector<2x64xf32>
    %244 = vector.extract_strided_slice %243 {offsets = [0, 0], sizes = [2, 32], strides = [1, 1]} : vector<2x64xf32> to vector<2x32xf32>
    %c4_67 = arith.constant 4 : index
    %c0_68 = arith.constant 0 : index
    %c0_69 = arith.constant 0 : index
    %245 = vector.load %arg4[%c4_67, %c0_68, %c0_69] : memref<8x2x64xf32, #tpu.memory_space<vmem>>, vector<1x2x32xf32>
    %246 = vector.shape_cast %245 : vector<1x2x32xf32> to vector<2x32xf32>
    %247 = vector.shape_cast %244 : vector<2x32xf32> to vector<1x2x32xf32>
    tpu.vector_store %arg4[%c4_67, %c0_68, %c0_69], %247 {strides = array<i32>} : memref<8x2x64xf32, #tpu.memory_space<vmem>>, vector<1x2x32xf32>,
    %248 = vector.extract_strided_slice %243 {offsets = [0, 32], sizes = [2, 32], strides = [1, 1]} : vector<2x64xf32> to vector<2x32xf32>
    %c3_70 = arith.constant 3 : index
    %c0_71 = arith.constant 0 : index
    %c32_72 = arith.constant 32 : index
    %249 = vector.load %arg4[%c3_70, %c0_71, %c32_72] : memref<8x2x64xf32, #tpu.memory_space<vmem>>, vector<1x2x32xf32>
    %250 = vector.shape_cast %249 : vector<1x2x32xf32> to vector<2x32xf32>
    %251 = vector.shape_cast %248 : vector<2x32xf32> to vector<1x2x32xf32>
    tpu.vector_store %arg4[%c3_70, %c0_71, %c32_72], %251 {strides = array<i32>} : memref<8x2x64xf32, #tpu.memory_space<vmem>>, vector<1x2x32xf32>,
    %252 = vector.extract_strided_slice %7 {offsets = [10, 0], sizes = [2, 192], strides = [1, 1]} : vector<16x192xf32> to vector<2x192xf32>
    %253 = vector.extract_strided_slice %7 {offsets = [4, 0], sizes = [2, 192], strides = [1, 1]} : vector<16x192xf32> to vector<2x192xf32>
    %254 = arith.select %30, %252, %253 : vector<2x192xi1>, vector<2x192xf32>
    %255 = arith.truncf %243 : vector<2x64xf32> to vector<2x64xbf16>
    %cst_73 = arith.constant dense<0.000000e+00> : vector<2x192xf32>
    %256 = tpu.matmul %255, %8, %cst_73 {dimension_numbers = #tpu.dot_dimension_numbers<[1], [0], [0], [1], [0, 0, 1, 1], [], []>} : vector<2x64xbf16>, vector<64x192xbf16>, vector<2x192xf32> -> vector<2x192xf32>
    %257 = vector.extract_strided_slice %254 {offsets = [0, 0], sizes = [2, 64], strides = [1, 1]} : vector<2x192xf32> to vector<2x64xf32>
    %258 = vector.extract_strided_slice %256 {offsets = [0, 0], sizes = [2, 64], strides = [1, 1]} : vector<2x192xf32> to vector<2x64xf32>
    %259 = arith.addf %257, %258 : vector<2x64xf32>
    %cst_74 = arith.constant 5.000000e-01 : f32
    %260 = vector.broadcast %cst_74 : f32 to vector<2x64xf32>
    %261 = arith.mulf %260, %259 : vector<2x64xf32>
    %262 = math.tanh %261 : vector<2x64xf32>
    %cst_75 = arith.constant 1.000000e+00 : f32
    %263 = vector.broadcast %cst_75 : f32 to vector<2x64xf32>
    %264 = arith.addf %262, %263 : vector<2x64xf32>
    %cst_76 = arith.constant 5.000000e-01 : f32
    %265 = vector.broadcast %cst_76 : f32 to vector<2x64xf32>
    %266 = arith.mulf %265, %264 : vector<2x64xf32>
    %267 = vector.extract_strided_slice %254 {offsets = [0, 64], sizes = [2, 64], strides = [1, 1]} : vector<2x192xf32> to vector<2x64xf32>
    %268 = vector.extract_strided_slice %256 {offsets = [0, 64], sizes = [2, 64], strides = [1, 1]} : vector<2x192xf32> to vector<2x64xf32>
    %269 = arith.addf %267, %268 : vector<2x64xf32>
    %cst_77 = arith.constant 5.000000e-01 : f32
    %270 = vector.broadcast %cst_77 : f32 to vector<2x64xf32>
    %271 = arith.mulf %270, %269 : vector<2x64xf32>
    %272 = math.tanh %271 : vector<2x64xf32>
    %cst_78 = arith.constant 1.000000e+00 : f32
    %273 = vector.broadcast %cst_78 : f32 to vector<2x64xf32>
    %274 = arith.addf %272, %273 : vector<2x64xf32>
    %cst_79 = arith.constant 5.000000e-01 : f32
    %275 = vector.broadcast %cst_79 : f32 to vector<2x64xf32>
    %276 = arith.mulf %275, %274 : vector<2x64xf32>
    %277 = vector.extract_strided_slice %254 {offsets = [0, 128], sizes = [2, 64], strides = [1, 1]} : vector<2x192xf32> to vector<2x64xf32>
    %278 = vector.extract_strided_slice %256 {offsets = [0, 128], sizes = [2, 64], strides = [1, 1]} : vector<2x192xf32> to vector<2x64xf32>
    %279 = arith.addf %278, %11 : vector<2x64xf32>
    %280 = arith.mulf %266, %279 : vector<2x64xf32>
    %281 = arith.addf %277, %280 : vector<2x64xf32>
    %282 = math.tanh %281 : vector<2x64xf32>
    %cst_80 = arith.constant 1.000000e+00 : f32
    %283 = vector.broadcast %cst_80 : f32 to vector<2x64xf32>
    %284 = arith.subf %283, %276 : vector<2x64xf32>
    %285 = arith.mulf %284, %282 : vector<2x64xf32>
    %286 = arith.mulf %276, %243 : vector<2x64xf32>
    %287 = arith.addf %285, %286 : vector<2x64xf32>
    %288 = vector.extract_strided_slice %287 {offsets = [0, 0], sizes = [2, 32], strides = [1, 1]} : vector<2x64xf32> to vector<2x32xf32>
    %c5_81 = arith.constant 5 : index
    %c0_82 = arith.constant 0 : index
    %c0_83 = arith.constant 0 : index
    %289 = vector.load %arg4[%c5_81, %c0_82, %c0_83] : memref<8x2x64xf32, #tpu.memory_space<vmem>>, vector<1x2x32xf32>
    %290 = vector.shape_cast %289 : vector<1x2x32xf32> to vector<2x32xf32>
    %291 = vector.shape_cast %288 : vector<2x32xf32> to vector<1x2x32xf32>
    tpu.vector_store %arg4[%c5_81, %c0_82, %c0_83], %291 {strides = array<i32>} : memref<8x2x64xf32, #tpu.memory_space<vmem>>, vector<1x2x32xf32>,
    %292 = vector.extract_strided_slice %287 {offsets = [0, 32], sizes = [2, 32], strides = [1, 1]} : vector<2x64xf32> to vector<2x32xf32>
    %c2_84 = arith.constant 2 : index
    %c0_85 = arith.constant 0 : index
    %c32_86 = arith.constant 32 : index
    %293 = vector.load %arg4[%c2_84, %c0_85, %c32_86] : memref<8x2x64xf32, #tpu.memory_space<vmem>>, vector<1x2x32xf32>
    %294 = vector.shape_cast %293 : vector<1x2x32xf32> to vector<2x32xf32>
    %295 = vector.shape_cast %292 : vector<2x32xf32> to vector<1x2x32xf32>
    tpu.vector_store %arg4[%c2_84, %c0_85, %c32_86], %295 {strides = array<i32>} : memref<8x2x64xf32, #tpu.memory_space<vmem>>, vector<1x2x32xf32>,
    %296 = vector.extract_strided_slice %7 {offsets = [12, 0], sizes = [2, 192], strides = [1, 1]} : vector<16x192xf32> to vector<2x192xf32>
    %297 = vector.extract_strided_slice %7 {offsets = [2, 0], sizes = [2, 192], strides = [1, 1]} : vector<16x192xf32> to vector<2x192xf32>
    %298 = arith.select %30, %296, %297 : vector<2x192xi1>, vector<2x192xf32>
    %299 = arith.truncf %287 : vector<2x64xf32> to vector<2x64xbf16>
    %cst_87 = arith.constant dense<0.000000e+00> : vector<2x192xf32>
    %300 = tpu.matmul %299, %8, %cst_87 {dimension_numbers = #tpu.dot_dimension_numbers<[1], [0], [0], [1], [0, 0, 1, 1], [], []>} : vector<2x64xbf16>, vector<64x192xbf16>, vector<2x192xf32> -> vector<2x192xf32>
    %301 = vector.extract_strided_slice %298 {offsets = [0, 0], sizes = [2, 64], strides = [1, 1]} : vector<2x192xf32> to vector<2x64xf32>
    %302 = vector.extract_strided_slice %300 {offsets = [0, 0], sizes = [2, 64], strides = [1, 1]} : vector<2x192xf32> to vector<2x64xf32>
    %303 = arith.addf %301, %302 : vector<2x64xf32>
    %cst_88 = arith.constant 5.000000e-01 : f32
    %304 = vector.broadcast %cst_88 : f32 to vector<2x64xf32>
    %305 = arith.mulf %304, %303 : vector<2x64xf32>
    %306 = math.tanh %305 : vector<2x64xf32>
    %cst_89 = arith.constant 1.000000e+00 : f32
    %307 = vector.broadcast %cst_89 : f32 to vector<2x64xf32>
    %308 = arith.addf %306, %307 : vector<2x64xf32>
    %cst_90 = arith.constant 5.000000e-01 : f32
    %309 = vector.broadcast %cst_90 : f32 to vector<2x64xf32>
    %310 = arith.mulf %309, %308 : vector<2x64xf32>
    %311 = vector.extract_strided_slice %298 {offsets = [0, 64], sizes = [2, 64], strides = [1, 1]} : vector<2x192xf32> to vector<2x64xf32>
    %312 = vector.extract_strided_slice %300 {offsets = [0, 64], sizes = [2, 64], strides = [1, 1]} : vector<2x192xf32> to vector<2x64xf32>
    %313 = arith.addf %311, %312 : vector<2x64xf32>
    %cst_91 = arith.constant 5.000000e-01 : f32
    %314 = vector.broadcast %cst_91 : f32 to vector<2x64xf32>
    %315 = arith.mulf %314, %313 : vector<2x64xf32>
    %316 = math.tanh %315 : vector<2x64xf32>
    %cst_92 = arith.constant 1.000000e+00 : f32
    %317 = vector.broadcast %cst_92 : f32 to vector<2x64xf32>
    %318 = arith.addf %316, %317 : vector<2x64xf32>
    %cst_93 = arith.constant 5.000000e-01 : f32
    %319 = vector.broadcast %cst_93 : f32 to vector<2x64xf32>
    %320 = arith.mulf %319, %318 : vector<2x64xf32>
    %321 = vector.extract_strided_slice %298 {offsets = [0, 128], sizes = [2, 64], strides = [1, 1]} : vector<2x192xf32> to vector<2x64xf32>
    %322 = vector.extract_strided_slice %300 {offsets = [0, 128], sizes = [2, 64], strides = [1, 1]} : vector<2x192xf32> to vector<2x64xf32>
    %323 = arith.addf %322, %11 : vector<2x64xf32>
    %324 = arith.mulf %310, %323 : vector<2x64xf32>
    %325 = arith.addf %321, %324 : vector<2x64xf32>
    %326 = math.tanh %325 : vector<2x64xf32>
    %cst_94 = arith.constant 1.000000e+00 : f32
    %327 = vector.broadcast %cst_94 : f32 to vector<2x64xf32>
    %328 = arith.subf %327, %320 : vector<2x64xf32>
    %329 = arith.mulf %328, %326 : vector<2x64xf32>
    %330 = arith.mulf %320, %287 : vector<2x64xf32>
    %331 = arith.addf %329, %330 : vector<2x64xf32>
    %332 = vector.extract_strided_slice %331 {offsets = [0, 0], sizes = [2, 32], strides = [1, 1]} : vector<2x64xf32> to vector<2x32xf32>
    %c6_95 = arith.constant 6 : index
    %c0_96 = arith.constant 0 : index
    %c0_97 = arith.constant 0 : index
    %333 = vector.load %arg4[%c6_95, %c0_96, %c0_97] : memref<8x2x64xf32, #tpu.memory_space<vmem>>, vector<1x2x32xf32>
    %334 = vector.shape_cast %333 : vector<1x2x32xf32> to vector<2x32xf32>
    %335 = vector.shape_cast %332 : vector<2x32xf32> to vector<1x2x32xf32>
    tpu.vector_store %arg4[%c6_95, %c0_96, %c0_97], %335 {strides = array<i32>} : memref<8x2x64xf32, #tpu.memory_space<vmem>>, vector<1x2x32xf32>,
    %336 = vector.extract_strided_slice %331 {offsets = [0, 32], sizes = [2, 32], strides = [1, 1]} : vector<2x64xf32> to vector<2x32xf32>
    %c1_98 = arith.constant 1 : index
    %c0_99 = arith.constant 0 : index
    %c32_100 = arith.constant 32 : index
    %337 = vector.load %arg4[%c1_98, %c0_99, %c32_100] : memref<8x2x64xf32, #tpu.memory_space<vmem>>, vector<1x2x32xf32>
    %338 = vector.shape_cast %337 : vector<1x2x32xf32> to vector<2x32xf32>
    %339 = vector.shape_cast %336 : vector<2x32xf32> to vector<1x2x32xf32>
    tpu.vector_store %arg4[%c1_98, %c0_99, %c32_100], %339 {strides = array<i32>} : memref<8x2x64xf32, #tpu.memory_space<vmem>>, vector<1x2x32xf32>,
    %340 = vector.extract_strided_slice %7 {offsets = [14, 0], sizes = [2, 192], strides = [1, 1]} : vector<16x192xf32> to vector<2x192xf32>
    %341 = vector.extract_strided_slice %7 {offsets = [0, 0], sizes = [2, 192], strides = [1, 1]} : vector<16x192xf32> to vector<2x192xf32>
    %342 = arith.select %30, %340, %341 : vector<2x192xi1>, vector<2x192xf32>
    %343 = arith.truncf %331 : vector<2x64xf32> to vector<2x64xbf16>
    %cst_101 = arith.constant dense<0.000000e+00> : vector<2x192xf32>
    %344 = tpu.matmul %343, %8, %cst_101 {dimension_numbers = #tpu.dot_dimension_numbers<[1], [0], [0], [1], [0, 0, 1, 1], [], []>} : vector<2x64xbf16>, vector<64x192xbf16>, vector<2x192xf32> -> vector<2x192xf32>
    %345 = vector.extract_strided_slice %342 {offsets = [0, 0], sizes = [2, 64], strides = [1, 1]} : vector<2x192xf32> to vector<2x64xf32>
    %346 = vector.extract_strided_slice %344 {offsets = [0, 0], sizes = [2, 64], strides = [1, 1]} : vector<2x192xf32> to vector<2x64xf32>
    %347 = arith.addf %345, %346 : vector<2x64xf32>
    %cst_102 = arith.constant 5.000000e-01 : f32
    %348 = vector.broadcast %cst_102 : f32 to vector<2x64xf32>
    %349 = arith.mulf %348, %347 : vector<2x64xf32>
    %350 = math.tanh %349 : vector<2x64xf32>
    %cst_103 = arith.constant 1.000000e+00 : f32
    %351 = vector.broadcast %cst_103 : f32 to vector<2x64xf32>
    %352 = arith.addf %350, %351 : vector<2x64xf32>
    %cst_104 = arith.constant 5.000000e-01 : f32
    %353 = vector.broadcast %cst_104 : f32 to vector<2x64xf32>
    %354 = arith.mulf %353, %352 : vector<2x64xf32>
    %355 = vector.extract_strided_slice %342 {offsets = [0, 64], sizes = [2, 64], strides = [1, 1]} : vector<2x192xf32> to vector<2x64xf32>
    %356 = vector.extract_strided_slice %344 {offsets = [0, 64], sizes = [2, 64], strides = [1, 1]} : vector<2x192xf32> to vector<2x64xf32>
    %357 = arith.addf %355, %356 : vector<2x64xf32>
    %cst_105 = arith.constant 5.000000e-01 : f32
    %358 = vector.broadcast %cst_105 : f32 to vector<2x64xf32>
    %359 = arith.mulf %358, %357 : vector<2x64xf32>
    %360 = math.tanh %359 : vector<2x64xf32>
    %cst_106 = arith.constant 1.000000e+00 : f32
    %361 = vector.broadcast %cst_106 : f32 to vector<2x64xf32>
    %362 = arith.addf %360, %361 : vector<2x64xf32>
    %cst_107 = arith.constant 5.000000e-01 : f32
    %363 = vector.broadcast %cst_107 : f32 to vector<2x64xf32>
    %364 = arith.mulf %363, %362 : vector<2x64xf32>
    %365 = vector.extract_strided_slice %342 {offsets = [0, 128], sizes = [2, 64], strides = [1, 1]} : vector<2x192xf32> to vector<2x64xf32>
    %366 = vector.extract_strided_slice %344 {offsets = [0, 128], sizes = [2, 64], strides = [1, 1]} : vector<2x192xf32> to vector<2x64xf32>
    %367 = arith.addf %366, %11 : vector<2x64xf32>
    %368 = arith.mulf %354, %367 : vector<2x64xf32>
    %369 = arith.addf %365, %368 : vector<2x64xf32>
    %370 = math.tanh %369 : vector<2x64xf32>
    %cst_108 = arith.constant 1.000000e+00 : f32
    %371 = vector.broadcast %cst_108 : f32 to vector<2x64xf32>
    %372 = arith.subf %371, %364 : vector<2x64xf32>
    %373 = arith.mulf %372, %370 : vector<2x64xf32>
    %374 = arith.mulf %364, %331 : vector<2x64xf32>
    %375 = arith.addf %373, %374 : vector<2x64xf32>
    %376 = vector.extract_strided_slice %375 {offsets = [0, 0], sizes = [2, 32], strides = [1, 1]} : vector<2x64xf32> to vector<2x32xf32>
    %c7_109 = arith.constant 7 : index
    %c0_110 = arith.constant 0 : index
    %c0_111 = arith.constant 0 : index
    %377 = vector.load %arg4[%c7_109, %c0_110, %c0_111] : memref<8x2x64xf32, #tpu.memory_space<vmem>>, vector<1x2x32xf32>
    %378 = vector.shape_cast %377 : vector<1x2x32xf32> to vector<2x32xf32>
    %379 = vector.shape_cast %376 : vector<2x32xf32> to vector<1x2x32xf32>
    tpu.vector_store %arg4[%c7_109, %c0_110, %c0_111], %379 {strides = array<i32>} : memref<8x2x64xf32, #tpu.memory_space<vmem>>, vector<1x2x32xf32>,
    %380 = vector.extract_strided_slice %375 {offsets = [0, 32], sizes = [2, 32], strides = [1, 1]} : vector<2x64xf32> to vector<2x32xf32>
    %c0_112 = arith.constant 0 : index
    %c0_113 = arith.constant 0 : index
    %c32_114 = arith.constant 32 : index
    %381 = vector.load %arg4[%c0_112, %c0_113, %c32_114] : memref<8x2x64xf32, #tpu.memory_space<vmem>>, vector<1x2x32xf32>
    %382 = vector.shape_cast %381 : vector<1x2x32xf32> to vector<2x32xf32>
    %383 = vector.shape_cast %380 : vector<2x32xf32> to vector<1x2x32xf32>
    tpu.vector_store %arg4[%c0_112, %c0_113, %c32_114], %383 {strides = array<i32>} : memref<8x2x64xf32, #tpu.memory_space<vmem>>, vector<1x2x32xf32>,
    %384 = vector.extract_strided_slice %375 {offsets = [0, 0], sizes = [2, 32], strides = [1, 1]} : vector<2x64xf32> to vector<2x32xf32>
    %c0_115 = arith.constant 0 : index
    %c0_116 = arith.constant 0 : index
    %c0_117 = arith.constant 0 : index
    %385 = vector.load %arg5[%c0_115, %c0_116, %c0_117] : memref<2x2x32xf32, #tpu.memory_space<vmem>>, vector<1x2x32xf32>
    %386 = vector.shape_cast %385 : vector<1x2x32xf32> to vector<2x32xf32>
    %387 = vector.shape_cast %384 : vector<2x32xf32> to vector<1x2x32xf32>
    tpu.vector_store %arg5[%c0_115, %c0_116, %c0_117], %387 {strides = array<i32>} : memref<2x2x32xf32, #tpu.memory_space<vmem>>, vector<1x2x32xf32>,
    %388 = vector.extract_strided_slice %375 {offsets = [0, 32], sizes = [2, 32], strides = [1, 1]} : vector<2x64xf32> to vector<2x32xf32>
    %c1_118 = arith.constant 1 : index
    %c0_119 = arith.constant 0 : index
    %c0_120 = arith.constant 0 : index
    %389 = vector.load %arg5[%c1_118, %c0_119, %c0_120] : memref<2x2x32xf32, #tpu.memory_space<vmem>>, vector<1x2x32xf32>
    %390 = vector.shape_cast %389 : vector<1x2x32xf32> to vector<2x32xf32>
    %391 = vector.shape_cast %388 : vector<2x32xf32> to vector<1x2x32xf32>
    tpu.vector_store %arg5[%c1_118, %c0_119, %c0_120], %391 {strides = array<i32>} : memref<2x2x32xf32, #tpu.memory_space<vmem>>, vector<1x2x32xf32>,
    return
  }
}

</mosaic_0001>

<bundles_post_ra>
// kernel: tpu_custom_call.1
= control target key start
LH: loop header
LB: loop body
LE: loop exit
PB: predicated region body
PF: predicated region fallthrough
CT: control target
= control target key end

     0   :  { %11 = vsyncpa [#allocation3], 0  ;;  %s1321_s0 = inlined_call_operand.vmem [shape: s32[16,1], index: 0, kind: input, shape index: {}]   ;;  %s1322_s1 = inlined_call_operand.hbm [shape: f32[32,192], index: 1, kind: input, shape index: {}]   ;;  %s1323_s2 = inlined_call_operand.hbm [shape: bf16[64,192], index: 2, kind: input, shape index: {}]   ;;  %s1324_s3 = inlined_call_operand.vmem [shape: f32[1,64], index: 3, kind: input, shape index: {}]   ;;  %s1325_s4 = inlined_call_operand.hbm [shape: f32[8,2,64], index: 4, kind: output, shape index: {0}]   ;;  %s1326_s5 = inlined_call_operand.hbm [shape: f32[2,2,32], index: 5, kind: output, shape index: {1}]  }
   0x1   :  { %12 = vsyncpa [#allocation6], 0 }
   0x2   :  { %13 = vsyncpa [#allocation4], 0 }
   0x3   :  { %14 = vsyncpa [#allocation9], 0  ;;  %s21_s20 = sshll.u32 %s1322_s1, 4  ;;  %s1008_s21 = smov [#allocation2]   ;;  %s22_s20 = int_to_ptr.hbm [resolvable:$true] %s21_s20 }
   0x4   :  { %s23_s22 = sshll.u32 %s1008_s21, 4  ;;  %s34_s25 = sshll.u32 %s1323_s2, 4  ;;  %s24_s22 = int_to_ptr.vmem [resolvable:$true] %s23_s22  ;;  %s35_s25 = int_to_ptr.hbm [resolvable:$true] %s34_s25 }
   0x5   :  { %s1009_s26 = smov 256   ;;  %s1010_s27 = smov 16  }
   0x6   :  { %29 = dma.hbm_to_vmem [thread:$0]  %s22_s20, 1024, %s24_s22, [#allocation3], %s1009_s26, %s1009_s26, %s1010_s27  }
   0x7   :  { %s1011_s28 = smov [#allocation5]   ;;  %s1012_s30 = smov 128  }
   0x8   :  { %s36_s29 = sshll.u32 %s1011_s28, 4  ;;  %s1013_s6 = smov 8   ;;  %s37_s29 = int_to_ptr.vmem [resolvable:$true] %s36_s29 }
   0x9   :  { %42 = dma.hbm_to_vmem [thread:$0]  %s35_s25, 1024, %s37_s29, [#allocation6], %s1012_s30, %s1012_s30, %s1013_s6  }
   0xa   :  { %1000 = dma.done.wait [#allocation3], 1024  }
   0xb   :  { %1001 = vsyncadd [#allocation3], 4294966272 }
   0xc   :  { %1002 = dma.done.wait [#allocation6], 1024  }
   0xd   :  { %1003 = vsyncadd [#allocation6], 4294966272  ;;  %v1014_v0 = vmov 0   ;;  %v56_v1 = vld [vmem:[%s1321_s0] sm:$0xff]  ;;  %v829_v2 = vld [vmem:[#allocation5 + $0x30] sm:$0xf]  ;;  %v54_v35 = vlaneseq }
   0xe   :  { %870 = vset.pattern.permute.xlu0 %v1014_v0  ;;  %v856_v3 = vld [vmem:[#allocation5 + $0x34] sm:$0xf0]  ;;  %v821_v4 = vld [vmem:[#allocation5 + $0x20] sm:$0xf]  ;;  %v854_v5 = vld [vmem:[#allocation5 + $0x24] sm:$0xf0] }
   0xf   :  { %59 = vperm.xlu0 %870, %v56_v1   ;;  %v1061_v6 = vor.u32 %v856_v3, %v829_v2  ;;  %v76_v7 = vld [vmem:[#allocation2 + $0x30] sm:$0xff]  ;;  %v77_v9 = vld [vmem:[#allocation2 + $0x38] sm:$0xff]  ;;  %v1064_v10 = vor.u32 %v854_v5, %v821_v4  ;;  %v74_v11 = vld [vmem:[#allocation2 + $0x20] sm:$0xff]  ;;  %v55_v36 = vand.u32 127, %v54_v35  ;;  %vm78_vm0 = vcmask 261120   ;;  %s1016_s10 = smov 64  }
  0x10   :  { %v813_v8 = vld [vmem:[#allocation5 + $0x10] sm:$0xf]  ;;  %97 = vmatpush.msra.mxu0 %v76_v7  ;;  %120 = vmatpush.msra.mxu1 %v77_v9  ;;  %v75_v12 = vld [vmem:[#allocation2 + $0x28] sm:$0xff]  ;;  %v855_v13 = vld [vmem:[#allocation5 + $0x34] sm:$0xf]  ;;  %v1015_v38 = vmov 0.0  }
  0x11   :  { %226 = vmatpush.bf16.msra.mxu2 %v1061_v6  ;;  %v852_v14 = vld [vmem:[#allocation5 + $0x14] sm:$0xf0]  ;;  %v831_v15 = vld [vmem:[#allocation5 + $0x38] sm:$0xf0]  ;;  %v72_v16 = vld [vmem:[#allocation2 + $0x10] sm:$0xff]  ;;  %v143_v46 = vadd.s32 128, %v55_v36 }
  0x12   :  { %98 = vmatpush.msra.mxu0 %v74_v11  ;;  %v57_v17 = vld [vmem:[%s1321_s0 + $0x8] sm:$0xff]  ;;  %121 = vmatpush.msra.mxu1 %v75_v12  ;;  %v1069_v18 = vor.u32 %v855_v13, %v831_v15  ;;  %v73_v19 = vld [vmem:[#allocation2 + $0x18] sm:$0xff]  ;;  %v1072_v20 = vor.u32 %v852_v14, %v813_v8  ;;  %v805_v21 = vld [vmem:[#allocation5] sm:$0xf]  ;;  %v148_v49 = vand.u32 63, %v55_v36  ;;  %vm218_vm5 = vcmask 523264  }
  0x13   :  { %v850_v22 = vld [vmem:[#allocation5 + $0x4] sm:$0xf0]  ;;  %v853_v24 = vld [vmem:[#allocation5 + $0x24] sm:$0xf]  ;;  %v823_v25 = vld [vmem:[#allocation5 + $0x28] sm:$0xf0] }
  0x14   :  { %99 = vmatpush.msra.mxu0 %v72_v16  ;;  %239 = vmatpush.bf16.msra.mxu3 %v1069_v18  ;;  %v1076_v23 = vor.u32 %v850_v22, %v805_v21  ;;  %v1088_v26 = vor.u32 %v853_v24, %v823_v25  ;;  %v70_v27 = vld [vmem:[#allocation2] sm:$0xff]  ;;  %v71_v28 = vld [vmem:[#allocation2 + $0x8] sm:$0xff]  ;;  %v851_v29 = vld [vmem:[#allocation5 + $0x14] sm:$0xf]  ;;  %v155_v50 = vand.u32 63, %v143_v46  ;;  %vm1126_vm3 = vcmp.lt.s32.totalorder %v148_v49, 32 }
  0x15   :  { %227 = vmatpush.bf16.msra.mxu2 %v1064_v10  ;;  %122 = vmatpush.msra.mxu1 %v73_v19  ;;  %v815_v30 = vld [vmem:[#allocation5 + $0x18] sm:$0xf0]  ;;  %v849_v32 = vld [vmem:[#allocation5 + $0x4] sm:$0xf]  ;;  %v807_v33 = vld [vmem:[#allocation5 + $0x8] sm:$0xf0] }
  0x16   :  { %100 = vmatpush.msra.mxu0 %v70_v27  ;;  %v1092_v31 = vor.u32 %v851_v29, %v815_v30  ;;  %v1097_v34 = vor.u32 %v849_v32, %v807_v33  ;;  %vm1130_vm4 = vcmp.lt.s32.totalorder %v155_v50, 32  ;;  %v1166_v8 = vld [vmem:[%s1324_s3] ss:$0 sm:$0xff]  ;;  %vm269_vm6 = vcmask 254976   ;;  %s1017_s3 = smov 32   ;;  %s1018_s11 = smov [#allocation7]  }
  0x17   :  { %62 = vperm.xlu0 %870, %v57_v17   ;;  %123 = vmatpush.msra.mxu1 %v71_v28  ;;  %vm272_vm7 = vcmask 517376   ;;  %vm481_vm8 = vcmask 261126   ;;  %vm484_vm9 = vcmask 523526   ;;  %vm343_vm10 = vcmask 257026   ;;  %s763_s12 = sshll.u32 %s1018_s11, 4  ;;  %s765_s15 = sshll.u32 %s1325_s4, 4  ;;  %s764_s12 = int_to_ptr.vmem [resolvable:$true] %s763_s12  ;;  %s766_s15 = int_to_ptr.hbm [resolvable:$true] %s765_s15 }
  0x18   :  { %240 = vmatpush.bf16.msra.mxu3 %v1088_v26  ;;  %291 = vmatpush.bf16.msrb.mxu0 %v1061_v6  ;;  %vm346_vm11 = vcmask 519426   ;;  %vm412_vm12 = vcmask 259076   ;;  %vm415_vm13 = vcmask 521476   ;;  %s1019_s16 = smov [#allocation8]   ;;  %s778_s20 = sshll.u32 %s1326_s5, 4  ;;  %s779_s20 = int_to_ptr.hbm [resolvable:$true] %s778_s20 }
  0x19   :  { %228 = vmatpush.bf16.msra.mxu2 %v1072_v20  ;;  %304 = vmatpush.bf16.msrb.mxu1 %v1069_v18  ;;  %s776_s17 = sshll.u32 %s1019_s16, 4  ;;  %s1020_s21 = smov 2   ;;  %s777_s17 = int_to_ptr.vmem [resolvable:$true] %s776_s17 }
  0x1c   :  { %241 = vmatpush.bf16.msra.mxu3 %v1092_v31  ;;  %292 = vmatpush.bf16.msrb.mxu0 %v1064_v10 }
  0x1d   :  { %229 = vmatpush.bf16.msra.mxu2 %v1076_v23  ;;  %305 = vmatpush.bf16.msrb.mxu1 %v1088_v26 }
  0x20   :  { %230 = vmatmul.bf16.vlgmr.msra.gmra.mxu2 %v1014_v0  ;;  %242 = vmatpush.bf16.msra.mxu3 %v1097_v34 }
  0x21   :  { %360 = vmatpush.bf16.msrb.mxu2 %v1061_v6  ;;  %293 = vmatpush.bf16.msrb.mxu0 %v1072_v20 }
  0x22   :  { %306 = vmatpush.bf16.msrb.mxu1 %v1092_v31 }
  0x23   :  { %243 = vmatmul.bf16.vlgmr.msra.gmra.mxu3 %v1014_v0 }
  0x24   :  { %373 = vmatpush.bf16.msrb.mxu3 %v1069_v18 }
  0x25   :  { %361 = vmatpush.bf16.msrb.mxu2 %v1064_v10  ;;  %294 = vmatpush.bf16.msrb.mxu0 %v1076_v23 }
  0x26   :  { %307 = vmatpush.bf16.msrb.mxu1 %v1097_v34 }
  0x28   :  { %374 = vmatpush.bf16.msrb.mxu3 %v1088_v26 }
  0x29   :  { %362 = vmatpush.bf16.msrb.mxu2 %v1072_v20 }
  0x2c   :  { %375 = vmatpush.bf16.msrb.mxu3 %v1092_v31 }
  0x2d   :  { %363 = vmatpush.bf16.msrb.mxu2 %v1076_v23 }
  0x30   :  { %376 = vmatpush.bf16.msrb.mxu3 %v1097_v34 }
  0x31   :  { %506 = vmatpush.bf16.msra.mxu2 %v1061_v6 }
  0x34   :  { %519 = vmatpush.bf16.msra.mxu3 %v1069_v18 }
  0x35   :  { %507 = vmatpush.bf16.msra.mxu2 %v1064_v10 }
  0x38   :  { %520 = vmatpush.bf16.msra.mxu3 %v1088_v26 }
  0x39   :  { %508 = vmatpush.bf16.msra.mxu2 %v1072_v20 }
  0x3c   :  { %521 = vmatpush.bf16.msra.mxu3 %v1092_v31 }
  0x3d   :  { %509 = vmatpush.bf16.msra.mxu2 %v1076_v23 }
  0x40   :  { %522 = vmatpush.bf16.msra.mxu3 %v1097_v34 }
  0x81   :  { %v60_v37 = vpop.permute.xlu0 %59 }
  0x82   :  { %vm64_vm1 = vcmp.eq.s32.totalorder %v55_v36, %v60_v37 }
  0x83   :  { %v797_v39 = vsel %vm64_vm1, 1.0, %v1015_v38 }
  0x84   :  { %799 = vmatmul.msk.f32.vlgmr.msra.gmra.mxu0 %vm78_vm0, %v797_v39  ;;  %801 = vmatmul.msk.f32.vlgmr.msra.gmra.mxu1 %vm78_vm0, %v797_v39 }
  0x85   :  { %429 = vmatpush.bf16.msra.mxu0 %v1061_v6  ;;  %442 = vmatpush.bf16.msra.mxu1 %v1069_v18 }
  0x89   :  { %v63_v40 = vpop.permute.xlu0 %62  ;;  %430 = vmatpush.bf16.msra.mxu0 %v1064_v10  ;;  %443 = vmatpush.bf16.msra.mxu1 %v1088_v26 }
  0x8a   :  { %vm65_vm2 = vcmp.eq.s32.totalorder %v55_v36, %v63_v40 }
  0x8b   :  { %v798_v41 = vsel %vm65_vm2, 1.0, %v1015_v38 }
  0x8c   :  { %800 = vmatmul.msk.f32.gmra.mxu0 %vm78_vm0, %v798_v41  ;;  %802 = vmatmul.msk.f32.gmra.mxu1 %vm78_vm0, %v798_v41 }
  0x8d   :  { %431 = vmatpush.bf16.msra.mxu0 %v1072_v20  ;;  %444 = vmatpush.bf16.msra.mxu1 %v1092_v31 }
  0x91   :  { %432 = vmatpush.bf16.msra.mxu0 %v1076_v23  ;;  %445 = vmatpush.bf16.msra.mxu1 %v1097_v34 }
  0xa3   :  { %v231_v42 = vpop.f32.mrf.mxu2 }
  0xa6   :  { %v244_v44 = vpop.f32.mrf.mxu3 }
  0xa7   :  { %v253_v12 = vadd.f32 %v1166_v8, %v244_v44 }
  0xab   :  { %v233_v43 = vpop.f32.mrf.mxu2 }
  0xae   :  { %v246_v45 = vpop.f32.mrf.mxu3 }
 0x101   :  { %v102_v47 = vpop.f32.mrf.mxu0  ;;  %v125_v48 = vpop.f32.mrf.mxu1 }
 0x102   :  { %v488_v53 = vrot.slane %v102_v47, 6  ;;  %v553_v54 = vrot.slane %v102_v47, 2  ;;  %v489_v55 = vrot.slane %v125_v48, 6  ;;  %v554_v56 = vrot.slane %v125_v48, 2 }
 0x109   :  { %v105_v57 = vpop.f32.mrf.mxu0  ;;  %v128_v58 = vpop.f32.mrf.mxu1 }
 0x10a   :  { %v172_v59 = vrot.slane %v105_v57, 6  ;;  %v274_v60 = vrot.slane %v105_v57, 2  ;;  %v275_v61 = vrot.slane %v128_v58, 2  ;;  %v1136_v62 = vsel %vm1130_vm4, %v128_v58, %v554_v56 }
 0x10b   :  { %v1140_v63 = vsel %vm1126_vm3, %v105_v57, %v488_v53  ;;  %v1144_v0 = vsel %vm1130_vm4, %v128_v58, %v489_v55  ;;  %v1148_v1 = vsel %vm1126_vm3, %v105_v57, %v553_v54  ;;  %v173_v13 = vrot.slane %v128_v58, 6 }
 0x10c   :  { %v1152_v2 = vsel %vm1126_vm3, %v102_v47, %v172_v59  ;;  %v1156_v3 = vsel %vm1126_vm3, %v102_v47, %v274_v60  ;;  %v1160_v4 = vsel %vm1130_vm4, %v125_v48, %v275_v61 }
 0x10d   :  { %v248_v5 = vadd.f32 %v231_v42, %v1152_v2  ;;  %v1171_v16 = vsel %vm1130_vm4, %v125_v48, %v173_v13 }
 0x10f   :  { %v249_v7 = vmul.f32 0.5, %v248_v5 }
 0x111   :  { %872 = vtanh.f32 %v249_v7 }
 0x117   :  { %v873_v9 = vpop.eup %872 }
 0x118   :  { %v251_v11 = vadd.f32 1.0, %v873_v9 }
 0x11a   :  { %v252_v14 = vmul.f32 0.5, %v251_v11 }
 0x11c   :  { %v254_v15 = vmul.f32 %v253_v12, %v252_v14  ;;  %v257_v21 = vsub.f32 1.0, %v252_v14  ;;  %v263_v24 = vmul.f32 0.0, %v252_v14 }
 0x11e   :  { %v255_v17 = vadd.f32 %v254_v15, %v1171_v16 }
 0x120   :  { %874 = vtanh.f32 %v255_v17 }
 0x126   :  { %v875_v19 = vpop.eup %874 }
 0x127   :  { %259 = vrot.lane.b32.xlu1 %v875_v19, %s1016_s10 }
 0x199   :  { %v260_v22 = vpop.permute.xlu1 %259 }
 0x19a   :  { %v262_v25 = vmul.f32 %v260_v22, %v257_v21 }
 0x19c   :  { %v1175_v27 = vadd.f32 %v263_v24, %v262_v25 }
 0x19e   :  { %v280_v28 = vpack.c.bf16 %v1175_v27, %v1175_v27  ;;  %v334_v48 = vrot.slane %v1175_v27, 6 }
 0x1a0   :  { %282 = vrot.lane.b32.xlu1 %v280_v28, %s1016_s10 }
 0x212   :  { %v283_v29 = vpop.permute.xlu1 %282 }
 0x213   :  { %835 = vmatmul.msk.bf16.vlgmr.msrb.gmra.mxu0 %vm218_vm5, %v283_v29  ;;  %836 = vmatmul.msk.bf16.vlgmr.msrb.gmra.mxu1 %vm218_vm5, %v283_v29 }
 0x214   :  { %570 = vmatpush.bf16.msrb.mxu0 %v1061_v6  ;;  %583 = vmatpush.bf16.msrb.mxu1 %v1069_v18 }
 0x218   :  { %571 = vmatpush.bf16.msrb.mxu0 %v1064_v10  ;;  %584 = vmatpush.bf16.msrb.mxu1 %v1088_v26 }
 0x21c   :  { %572 = vmatpush.bf16.msrb.mxu0 %v1072_v20  ;;  %585 = vmatpush.bf16.msrb.mxu1 %v1092_v31 }
 0x220   :  { %573 = vmatpush.bf16.msrb.mxu0 %v1076_v23  ;;  %586 = vmatpush.bf16.msrb.mxu1 %v1097_v34 }
 0x290   :  { %v296_v30 = vpop.f32.mrf.mxu0  ;;  %v309_v32 = vpop.f32.mrf.mxu1 }
 0x291   :  { %v314_v33 = vrot.slane %v296_v30, 6  ;;  %v321_v39 = vadd.f32 %v1166_v8, %v309_v32 }
 0x293   :  { %v316_v35 = vadd.f32 %v314_v33, %v1156_v3  ;;  %v323_v43 = vrot.slane %v321_v39, 6 }
 0x295   :  { %v317_v36 = vmul.f32 0.5, %v316_v35 }
 0x297   :  { %876 = vtanh.f32 %v317_v36 }
 0x298   :  { %v298_v37 = vpop.f32.mrf.mxu0  ;;  %v311_v38 = vpop.f32.mrf.mxu1 }
 0x29d   :  { %v877_v40 = vpop.eup %876 }
 0x29e   :  { %v319_v41 = vadd.f32 1.0, %v877_v40 }
 0x2a0   :  { %v320_v42 = vmul.f32 0.5, %v319_v41 }
 0x2a2   :  { %v325_v44 = vmul.f32 %v323_v43, %v320_v42  ;;  %v328_v47 = vsub.f32 1.0, %v320_v42  ;;  %v336_v50 = vmul.f32 %v334_v48, %v320_v42 }
 0x2a4   :  { %v326_v45 = vadd.f32 %v325_v44, %v1160_v4 }
 0x2a6   :  { %878 = vtanh.f32 %v326_v45 }
 0x2ac   :  { %v879_v46 = vpop.eup %878 }
 0x2ad   :  { %330 = vrot.lane.b32.xlu2 %v879_v46, %s1016_s10 }
 0x307   :  { %v331_v49 = vpop.permute.xlu2 %330 }
 0x308   :  { %v333_v51 = vmul.f32 %v331_v49, %v328_v47 }
 0x30a   :  { %v1195_v52 = vadd.f32 %v336_v50, %v333_v51 }
 0x30c   :  { %v348_v53 = vpack.c.bf16 %v1195_v52, %v1195_v52 }
 0x30e   :  { %v350_v54 = vrot.slane %v348_v53, 1 }
 0x310   :  { %351 = vrot.lane.b32.xlu2 %v350_v54, %s1016_s10 }
 0x36a   :  { %v352_v55 = vpop.permute.xlu2 %351 }
 0x36b   :  { %837 = vmatmul.msk.bf16.vlgmr.msrb.gmra.mxu2 %vm218_vm5, %v352_v55  ;;  %838 = vmatmul.msk.bf16.vlgmr.msrb.gmra.mxu3 %vm218_vm5, %v352_v55 }
 0x36c   :  { %635 = vmatpush.bf16.msrb.mxu2 %v1061_v6  ;;  %648 = vmatpush.bf16.msrb.mxu3 %v1069_v18 }
 0x370   :  { %636 = vmatpush.bf16.msrb.mxu2 %v1064_v10  ;;  %649 = vmatpush.bf16.msrb.mxu3 %v1088_v26 }
 0x374   :  { %637 = vmatpush.bf16.msrb.mxu2 %v1072_v20  ;;  %650 = vmatpush.bf16.msrb.mxu3 %v1092_v31 }
 0x378   :  { %638 = vmatpush.bf16.msrb.mxu2 %v1076_v23  ;;  %651 = vmatpush.bf16.msrb.mxu3 %v1097_v34 }
 0x3ee   :  { %v365_v56 = vpop.f32.mrf.mxu2  ;;  %v378_v57 = vpop.f32.mrf.mxu3 }
 0x3ef   :  { %v383_v58 = vrot.slane %v365_v56, 4  ;;  %v390_v7 = vadd.f32 %v1166_v8, %v378_v57 }
 0x3f1   :  { %v385_v59 = vadd.f32 %v383_v58, %v1152_v2  ;;  %v392_v13 = vrot.slane %v390_v7, 4  ;;  %v403_v2 = vrot.slane %v1195_v52, 6 }
 0x3f3   :  { %v386_v60 = vmul.f32 0.5, %v385_v59 }
 0x3f5   :  { %880 = vtanh.f32 %v386_v60 }
 0x3f6   :  { %v367_v61 = vpop.f32.mrf.mxu2  ;;  %v380_v5 = vpop.f32.mrf.mxu3 }
 0x3fb   :  { %v881_v9 = vpop.eup %880 }
 0x3fc   :  { %v388_v11 = vadd.f32 1.0, %v881_v9 }
 0x3fe   :  { %v389_v12 = vmul.f32 0.5, %v388_v11 }
 0x400   :  { %v394_v14 = vmul.f32 %v392_v13, %v389_v12  ;;  %v397_v19 = vsub.f32 1.0, %v389_v12  ;;  %v405_v22 = vmul.f32 %v403_v2, %v389_v12 }
 0x402   :  { %v395_v15 = vadd.f32 %v394_v14, %v1171_v16 }
 0x404   :  { %882 = vtanh.f32 %v395_v15 }
 0x40a   :  { %v883_v17 = vpop.eup %882 }
 0x40b   :  { %399 = vrot.lane.b32.xlu0 %v883_v17, %s1016_s10 }
 0x47d   :  { %v400_v21 = vpop.permute.xlu0 %399 }
 0x47e   :  { %v402_v24 = vmul.f32 %v400_v21, %v397_v19 }
 0x480   :  { %v1215_v25 = vadd.f32 %v405_v22, %v402_v24 }
 0x482   :  { %v417_v28 = vpack.c.bf16 %v1215_v25, %v1215_v25 }
 0x484   :  { %v419_v29 = vrot.slane %v417_v28, 2 }
 0x486   :  { %420 = vrot.lane.b32.xlu1 %v419_v29, %s1016_s10 }
 0x4f8   :  { %v421_v30 = vpop.permute.xlu1 %420 }
 0x4f9   :  { %839 = vmatmul.msk.bf16.vlgmr.msra.gmra.mxu0 %vm218_vm5, %v421_v30  ;;  %840 = vmatmul.msk.bf16.vlgmr.msra.gmra.mxu1 %vm218_vm5, %v421_v30 }
 0x4fa   :  { %700 = vmatpush.bf16.msra.mxu0 %v1061_v6  ;;  %713 = vmatpush.bf16.msra.mxu1 %v1069_v18 }
 0x4fe   :  { %701 = vmatpush.bf16.msra.mxu0 %v1064_v10  ;;  %714 = vmatpush.bf16.msra.mxu1 %v1088_v26 }
 0x502   :  { %702 = vmatpush.bf16.msra.mxu0 %v1072_v20  ;;  %715 = vmatpush.bf16.msra.mxu1 %v1092_v31 }
 0x506   :  { %703 = vmatpush.bf16.msra.mxu0 %v1076_v23  ;;  %716 = vmatpush.bf16.msra.mxu1 %v1097_v34 }
 0x576   :  { %v434_v16 = vpop.f32.mrf.mxu0  ;;  %v447_v32 = vpop.f32.mrf.mxu1 }
 0x577   :  { %v452_v33 = vrot.slane %v434_v16, 2  ;;  %v459_v10 = vadd.f32 %v1166_v8, %v447_v32 }
 0x579   :  { %v454_v35 = vadd.f32 %v452_v33, %v1156_v3  ;;  %v461_v38 = vrot.slane %v459_v10, 2  ;;  %v472_v3 = vrot.slane %v1215_v25, 6 }
 0x57b   :  { %v455_v6 = vmul.f32 0.5, %v454_v35 }
 0x57d   :  { %884 = vtanh.f32 %v455_v6 }
 0x57e   :  { %v436_v18 = vpop.f32.mrf.mxu0  ;;  %v449_v36 = vpop.f32.mrf.mxu1 }
 0x583   :  { %v885_v26 = vpop.eup %884 }
 0x584   :  { %v457_v37 = vadd.f32 1.0, %v885_v26 }
 0x586   :  { %v458_v20 = vmul.f32 0.5, %v457_v37 }
 0x588   :  { %v463_v31 = vmul.f32 %v461_v38, %v458_v20  ;;  %v466_v39 = vsub.f32 1.0, %v458_v20  ;;  %v474_v41 = vmul.f32 %v472_v3, %v458_v20 }
 0x58a   :  { %v464_v23 = vadd.f32 %v463_v31, %v1160_v4 }
 0x58c   :  { %886 = vtanh.f32 %v464_v23 }
 0x592   :  { %v887_v34 = vpop.eup %886 }
 0x593   :  { %468 = vrot.lane.b32.xlu2 %v887_v34, %s1016_s10 }
 0x5ed   :  { %v469_v40 = vpop.permute.xlu2 %468 }
 0x5ee   :  { %v471_v42 = vmul.f32 %v469_v40, %v466_v39 }
 0x5f0   :  { %v1235_v43 = vadd.f32 %v474_v41, %v471_v42 }
 0x5f2   :  { %v494_v44 = vpack.c.bf16 %v1235_v43, %v1235_v43  ;;  %v543_v61 = vrot.slane %v1235_v43, 6 }
 0x5f4   :  { %v496_v45 = vrot.slane %v494_v44, 3 }
 0x5f6   :  { %497 = vrot.lane.b32.xlu0 %v496_v45, %s1016_s10 }
 0x668   :  { %v498_v46 = vpop.permute.xlu0 %497 }
 0x669   :  { %841 = vmatmul.msk.bf16.vlgmr.msra.gmra.mxu2 %vm218_vm5, %v498_v46  ;;  %842 = vmatmul.msk.bf16.vlgmr.msra.gmra.mxu3 %vm218_vm5, %v498_v46 }
 0x6ec   :  { %v511_v4 = vpop.f32.mrf.mxu2  ;;  %v524_v47 = vpop.f32.mrf.mxu3 }
 0x6ed   :  { %v528_v48 = vadd.f32 %v511_v4, %v1140_v63  ;;  %v533_v56 = vadd.f32 %v1166_v8, %v524_v47 }
 0x6ef   :  { %v529_v49 = vmul.f32 0.5, %v528_v48 }
 0x6f1   :  { %888 = vtanh.f32 %v529_v49 }
 0x6f4   :  { %v513_v50 = vpop.f32.mrf.mxu2  ;;  %v526_v51 = vpop.f32.mrf.mxu3 }
 0x6f7   :  { %v889_v53 = vpop.eup %888 }
 0x6f8   :  { %v531_v54 = vadd.f32 1.0, %v889_v53 }
 0x6fa   :  { %v532_v55 = vmul.f32 0.5, %v531_v54 }
 0x6fc   :  { %v534_v57 = vmul.f32 %v533_v56, %v532_v55  ;;  %v537_v60 = vsub.f32 1.0, %v532_v55  ;;  %v545_v7 = vmul.f32 %v543_v61, %v532_v55 }
 0x6fe   :  { %v535_v58 = vadd.f32 %v534_v57, %v1144_v0 }
 0x700   :  { %890 = vtanh.f32 %v535_v58 }
 0x706   :  { %v891_v59 = vpop.eup %890 }
 0x707   :  { %539 = vrot.lane.b32.xlu1 %v891_v59, %s1016_s10 }
 0x779   :  { %v540_v5 = vpop.permute.xlu1 %539 }
 0x77a   :  { %v542_v9 = vmul.f32 %v540_v5, %v537_v60 }
 0x77c   :  { %v1247_v11 = vadd.f32 %v545_v7, %v542_v9 }
 0x77e   :  { %v559_v12 = vpack.c.bf16 %v1247_v11, %v1247_v11  ;;  %v613_v18 = vrot.slane %v1247_v11, 6 }
 0x780   :  { %561 = vrot.lane.b32.xlu2 %v559_v12, %s1016_s10 }
 0x7da   :  { %v562_v13 = vpop.permute.xlu2 %561 }
 0x7db   :  { %843 = vmatmul.msk.bf16.vlgmr.msrb.gmra.mxu0 %vm218_vm5, %v562_v13  ;;  %844 = vmatmul.msk.bf16.vlgmr.msrb.gmra.mxu1 %vm218_vm5, %v562_v13 }
 0x858   :  { %v575_v14 = vpop.f32.mrf.mxu0  ;;  %v588_v15 = vpop.f32.mrf.mxu1 }
 0x859   :  { %v593_v17 = vrot.slane %v575_v14, 6  ;;  %v600_v24 = vadd.f32 %v1166_v8, %v588_v15 }
 0x85b   :  { %v595_v19 = vadd.f32 %v593_v17, %v1148_v1  ;;  %v602_v16 = vrot.slane %v600_v24, 6 }
 0x85d   :  { %v596_v2 = vmul.f32 0.5, %v595_v19 }
 0x85f   :  { %892 = vtanh.f32 %v596_v2 }
 0x860   :  { %v577_v21 = vpop.f32.mrf.mxu0  ;;  %v590_v22 = vpop.f32.mrf.mxu1 }
 0x865   :  { %v893_v28 = vpop.eup %892 }
 0x866   :  { %v598_v29 = vadd.f32 1.0, %v893_v28 }
 0x868   :  { %v599_v30 = vmul.f32 0.5, %v598_v29 }
 0x86a   :  { %v604_v32 = vmul.f32 %v602_v16, %v599_v30  ;;  %v607_v6 = vsub.f32 1.0, %v599_v30  ;;  %v615_v10 = vmul.f32 %v613_v18, %v599_v30 }
 0x86c   :  { %v605_v33 = vadd.f32 %v604_v32, %v1136_v62 }
 0x86e   :  { %894 = vtanh.f32 %v605_v33 }
 0x874   :  { %v895_v35 = vpop.eup %894 }
 0x875   :  { %609 = vrot.lane.b32.xlu0 %v895_v35, %s1016_s10 }
 0x8e7   :  { %v610_v36 = vpop.permute.xlu0 %609 }
 0x8e8   :  { %v612_v26 = vmul.f32 %v610_v36, %v607_v6 }
 0x8ea   :  { %v1259_v37 = vadd.f32 %v615_v10, %v612_v26 }
 0x8ec   :  { %v623_v20 = vpack.c.bf16 %v1259_v37, %v1259_v37  ;;  %v678_v51 = vrot.slane %v1259_v37, 6 }
 0x8ee   :  { %v625_v38 = vrot.slane %v623_v20, 1 }
 0x8f0   :  { %626 = vrot.lane.b32.xlu1 %v625_v38, %s1016_s10 }
 0x962   :  { %v627_v31 = vpop.permute.xlu1 %626 }
 0x963   :  { %845 = vmatmul.msk.bf16.vlgmr.msrb.gmra.mxu2 %vm218_vm5, %v627_v31  ;;  %846 = vmatmul.msk.bf16.vlgmr.msrb.gmra.mxu3 %vm218_vm5, %v627_v31 }
 0x9e6   :  { %v640_v23 = vpop.f32.mrf.mxu2  ;;  %v653_v34 = vpop.f32.mrf.mxu3 }
 0x9e7   :  { %v658_v39 = vrot.slane %v640_v23, 4  ;;  %v665_v44 = vadd.f32 %v1166_v8, %v653_v34 }
 0x9e9   :  { %v660_v3 = vadd.f32 %v658_v39, %v1140_v63  ;;  %v667_v47 = vrot.slane %v665_v44, 4 }
 0x9eb   :  { %v661_v40 = vmul.f32 0.5, %v660_v3 }
 0x9ed   :  { %896 = vtanh.f32 %v661_v40 }
 0x9ee   :  { %v642_v41 = vpop.f32.mrf.mxu2  ;;  %v655_v42 = vpop.f32.mrf.mxu3 }
 0x9f3   :  { %v897_v45 = vpop.eup %896 }
 0x9f4   :  { %v663_v46 = vadd.f32 1.0, %v897_v45 }
 0x9f6   :  { %v664_v4 = vmul.f32 0.5, %v663_v46 }
 0x9f8   :  { %v669_v48 = vmul.f32 %v667_v47, %v664_v4  ;;  %v672_v63 = vsub.f32 1.0, %v664_v4  ;;  %v680_v54 = vmul.f32 %v678_v51, %v664_v4 }
 0x9fa   :  { %v670_v49 = vadd.f32 %v669_v48, %v1144_v0 }
 0x9fc   :  { %898 = vtanh.f32 %v670_v49 }
 0xa02   :  { %v899_v50 = vpop.eup %898 }
 0xa03   :  { %674 = vrot.lane.b32.xlu2 %v899_v50, %s1016_s10 }
 0xa0b   :  { %266 = vrot.lane.b32.xlu2 %v1175_v27, %s1016_s10 }
 0xa13   :  { %477 = vrot.lane.b32.xlu2 %v1235_v43, %s1016_s10 }
 0xa5d   :  { %v675_v53 = vpop.permute.xlu2 %674 }
 0xa5e   :  { %v677_v55 = vmul.f32 %v675_v53, %v672_v63 }
 0xa60   :  { %v681_v56 = vadd.f32 %v680_v54, %v677_v55 }
 0xa62   :  { %683 = vrot.lane.b32.xlu2 %v681_v56, %s1016_s10  ;;  %v688_v0 = vpack.c.bf16 %v681_v56, %v681_v56  ;;  %v743_v21 = vrot.slane %v681_v56, 6 }
 0xa64   :  { %v690_v57 = vrot.slane %v688_v0, 2 }
 0xa65   :  { %v267_v58 = vpop.permute.xlu2 %266 }
 0xa66   :  { %270 = vst.msk [vmem:[#allocation7] sm:$0x3] %vm269_vm6, %v267_v58  ;;  %691 = vrot.lane.b32.xlu0 %v690_v57, %s1016_s10 }
 0xa67   :  { %273 = vst.msk [vmem:[#allocation7 + $0xe] sm:$0x3] %vm272_vm7, %v267_v58 }
 0xa6d   :  { %v478_v27 = vpop.permute.xlu2 %477 }
 0xa6e   :  { %482 = vst.msk [vmem:[#allocation7] sm:$0xc0] %vm481_vm8, %v478_v27  ;;  %339 = vrot.lane.b32.xlu0 %v1195_v52, %s1016_s10 }
 0xa6f   :  { %485 = vst.msk [vmem:[#allocation7 + $0x2] sm:$0xc0] %vm484_vm9, %v478_v27 }
 0xa76   :  { %548 = vrot.lane.b32.xlu0 %v1247_v11, %s1016_s10 }
 0xabc   :  { %v684_v60 = vpop.permute.xlu2 %683 }
 0xad8   :  { %v692_v43 = vpop.permute.xlu0 %691 }
 0xad9   :  { %847 = vmatmul.msk.bf16.vlgmr.msra.gmra.mxu0 %vm218_vm5, %v692_v43  ;;  %848 = vmatmul.msk.bf16.vlgmr.msra.gmra.mxu1 %vm218_vm5, %v692_v43 }
 0xae0   :  { %v340_v59 = vpop.permute.xlu0 %339 }
 0xae1   :  { %344 = vst.msk [vmem:[#allocation7] sm:$0xc] %vm343_vm10, %v340_v59 }
 0xae2   :  { %347 = vst.msk [vmem:[#allocation7 + $0xa] sm:$0xc] %vm346_vm11, %v340_v59 }
 0xae3   :  { %686 = vst.msk [vmem:[#allocation7 + $0x8] sm:$0x30] %vm412_vm12, %v684_v60 }
 0xae4   :  { %687 = vst.msk [vmem:[#allocation7 - $0x2] sm:$0x30] %vm415_vm13, %v684_v60 }
 0xae8   :  { %v549_v52 = vpop.permute.xlu0 %548 }
 0xae9   :  { %551 = vst.msk [vmem:[#allocation7 + $0x8] sm:$0x3] %vm269_vm6, %v549_v52 }
 0xaea   :  { %552 = vst.msk [vmem:[#allocation7 + $0x6] sm:$0x3] %vm272_vm7, %v549_v52 }
 0xb56   :  { %v705_v61 = vpop.f32.mrf.mxu0  ;;  %v718_v5 = vpop.f32.mrf.mxu1 }
 0xb57   :  { %v723_v7 = vrot.slane %v705_v61, 2  ;;  %v730_v14 = vadd.f32 %v1166_v8, %v718_v5 }
 0xb59   :  { %v725_v9 = vadd.f32 %v723_v7, %v1148_v1  ;;  %v732_v2 = vrot.slane %v730_v14, 2 }
 0xb5b   :  { %v726_v11 = vmul.f32 0.5, %v725_v9 }
 0xb5d   :  { %900 = vtanh.f32 %v726_v11 }
 0xb5e   :  { %v707_v12 = vpop.f32.mrf.mxu0  ;;  %v720_v13 = vpop.f32.mrf.mxu1 }
 0xb63   :  { %v901_v15 = vpop.eup %900 }
 0xb64   :  { %v728_v17 = vadd.f32 1.0, %v901_v15 }
 0xb66   :  { %v729_v19 = vmul.f32 0.5, %v728_v17 }
 0xb68   :  { %v734_v22 = vmul.f32 %v732_v2, %v729_v19  ;;  %v745_v24 = vmul.f32 %v743_v21, %v729_v19  ;;  %v737_v1 = vsub.f32 1.0, %v729_v19 }
 0xb6a   :  { %v735_v28 = vadd.f32 %v734_v22, %v1136_v62 }
 0xb6c   :  { %902 = vtanh.f32 %v735_v28 }
 0xb72   :  { %v903_v29 = vpop.eup %902 }
 0xb73   :  { %739 = vrot.lane.b32.xlu1 %v903_v29, %s1016_s10 }
 0xb7b   :  { %408 = vrot.lane.b32.xlu1 %v1215_v25, %s1016_s10 }
 0xb83   :  { %618 = vrot.lane.b32.xlu1 %v1259_v37, %s1016_s10 }
 0xbe5   :  { %v740_v8 = vpop.permute.xlu1 %739 }
 0xbe6   :  { %v742_v30 = vmul.f32 %v740_v8, %v737_v1 }
 0xbe8   :  { %v746_v16 = vadd.f32 %v745_v24, %v742_v30 }
 0xbea   :  { %754 = vrot.lane.b32.xlu1 %v746_v16, %s1017_s3  ;;  %748 = vrot.lane.b32.xlu0 %v746_v16, %s1016_s10 }
 0xbed   :  { %v409_v62 = vpop.permute.xlu1 %408 }
 0xbee   :  { %413 = vst.msk [vmem:[#allocation7] sm:$0x30] %vm412_vm12, %v409_v62 }
 0xbef   :  { %416 = vst.msk [vmem:[#allocation7 + $0x6] sm:$0x30] %vm415_vm13, %v409_v62 }
 0xbf5   :  { %v619_v32 = vpop.permute.xlu1 %618 }
 0xbf6   :  { %621 = vst.msk [vmem:[#allocation7 + $0x8] sm:$0xc] %vm343_vm10, %v619_v32 }
 0xbf7   :  { %622 = vst.msk [vmem:[#allocation7 + $0x2] sm:$0xc] %vm346_vm11, %v619_v32 }
 0xc5c   :  { %v749_v25 = vpop.permute.xlu0 %748  ;;  %v755_v33 = vpop.permute.xlu1 %754 }
 0xc5d   :  { %751 = vst.msk [vmem:[#allocation7 + $0x8] sm:$0xc0] %vm481_vm8, %v749_v25 }
 0xc5e   :  { %752 = vst.msk [vmem:[#allocation7 - $0x6] sm:$0xc0] %vm484_vm9, %v749_v25 }
 0xc5f   :  { %753 = vst.msk [vmem:[#allocation8 - $0x6] sm:$0xc0] %vm481_vm8, %v749_v25  ;;  %771 = dma.vmem_to_hbm [thread:$0]  %s764_s12, 256, %s766_s15, [#allocation4], %s1017_s3, %s1017_s3, %s1020_s21  }
 0xc60   :  { %758 = vst.msk [vmem:[#allocation8 - $0x4] sm:$0xc0] %vm481_vm8, %v755_v33 }
 0xc61   :  { %784 = dma.vmem_to_hbm [thread:$0]  %s777_s17, 64, %s779_s20, [#allocation9], %s1017_s3, %s1017_s3, %s1020_s21  }
 0xc62   :  { %1004 = dma.done.wait [#allocation4], 256  }
 0xc63   :  { %1005 = vsyncadd [#allocation4], 4294967040 }
 0xc64   :  { %1006 = dma.done.wait [#allocation9], 64  }
 0xc65   :  { %1007 = vsyncadd [#allocation9], 4294967232 }
 0xc66   :  { %793 = vsyncpa [#allocation3], 1 }
 0xc67   :  { %794 = vsyncpa [#allocation6], 1 }
 0xc68   :  { %795 = vsyncpa [#allocation4], 1 }
 0xc69   :  { %796 = vsyncpa [#allocation9], 1 }

</bundles_post_ra>
